<compile_context>
chip_gen: v7x
topology: tpu7x:2x2x1
jax: 0.10.0
libtpu: 0.0.40
codegen_flags: <defaults>
</compile_context>

<pallas_src>
import functools

import jax
import jax.numpy as jnp
import numpy as np
from jax import lax
from jax.experimental import pallas as pl
from jax.experimental.pallas import tpu as pltpu


# ----------------------------- fused Pallas kernel ---------------------------

def _doc2vec_kernel(emb_ref, h0_ref, c0_ref, wih_ref, whh_ref, b_ref,
                    lw_ref, lb_ref, out_ref, *, out_size):
    """Fused BiLSTM + (h_n + c_n) + global-L2-norm + Linear + softmax.

    emb: (S, B, E) f32
    h0/c0: (2, B, H) f32
    wih: (E, 8H)    both directions' input weights, gates fused [i|f|g|o]
    whh: (2, H, 4H) per-direction recurrent weights, gates fused
    b:   (2, 1, 4H) b_ih + b_hh per direction, gates fused
    lw:  (2H, Opad) linear weight (lane-padded), lb: (1, Opad)
    out: (B, Opad)  softmax probabilities (padded lanes are 0)
    """
    S, B, _ = emb_ref.shape
    H = h0_ref.shape[2]
    G = 4 * H                      # per-direction fused gate width
    Opad = out_ref.shape[1]
    half = B // 2

    # ---- hoisted input projection (out of the serial recurrence) ----
    # One 8H(=256 for H=32)-wide matmul per timestep covering BOTH directions.
    wih = wih_ref[...]                                           # (E, 8H)
    xw = [jnp.dot(emb_ref[t], wih, preferred_element_type=jnp.float32)
          for t in range(S)]                                     # each (B, 8H)

    whh_f = whh_ref[0]                                           # (H, 4H)
    whh_b = whh_ref[1]
    bias_f = b_ref[0]                                            # (1, 4H)
    bias_b = b_ref[1]

    def cell(xg, h, c, whh_d, bias_d):
        # Single fused (H, 4H) recurrent matmul, then static gate slices.
        gates = xg + jnp.dot(h, whh_d, preferred_element_type=jnp.float32) + bias_d
        i = jax.nn.sigmoid(gates[:, 0:H])
        f = jax.nn.sigmoid(gates[:, H:2 * H])
        g = jnp.tanh(gates[:, 2 * H:3 * H])
        o = jax.nn.sigmoid(gates[:, 3 * H:4 * H])
        c_new = f * c + i * g
        h_new = o * jnp.tanh(c_new)
        return h_new, c_new

    h_f, c_f = h0_ref[0], c0_ref[0]
    h_b, c_b = h0_ref[1], c0_ref[1]
    # Fully unrolled (S static); forward & backward directions interleaved per
    # step so the two independent recurrences hide each other's MXU/EUP latency.
    for t in range(S):
        h_f, c_f = cell(xw[t][:, :G], h_f, c_f, whh_f, bias_f)
        h_b, c_b = cell(xw[S - 1 - t][:, G:], h_b, c_b, whh_b, bias_b)

    a0 = h_f + c_f                                               # (B, H)
    a1 = h_b + c_b
    # torch.norm(added): global Frobenius norm over both directions.
    inv_norm = lax.rsqrt(jnp.sum(a0 * a0) + jnp.sum(a1 * a1))
    a0 = a0 * inv_norm
    a1 = a1 * inv_norm

    # ---- head, reproducing torch's `.view(-1, 2H)` on the (2, B, H) state ----
    # Row i of the view is [row 2i ; row 2i+1] of the (2B, H) flattening, so for
    # even B each direction contributes B//2 output rows; select even/odd rows
    # with tiny constant 0/1 matmuls instead of an in-kernel reshape.
    w1 = lw_ref[0:H, :]                                          # (H, Opad)
    w2 = lw_ref[H:2 * H, :]                                      # (H, Opad)
    bias_o = lb_ref[...]                                         # (1, Opad)

    rows = lax.broadcasted_iota(jnp.int32, (half, B), 0)
    cols = lax.broadcasted_iota(jnp.int32, (half, B), 1)
    sel_even = (cols == 2 * rows).astype(jnp.float32)            # picks rows 0,2,...
    sel_odd = (cols == 2 * rows + 1).astype(jnp.float32)         # picks rows 1,3,...

    lane = lax.broadcasted_iota(jnp.int32, (half, Opad), 1)
    valid = lane < out_size                                      # mask lane padding

    def head(a_d):
        c_even = jnp.dot(a_d, w1, preferred_element_type=jnp.float32)   # (B, Opad)
        c_odd = jnp.dot(a_d, w2, preferred_element_type=jnp.float32)
        logits = (jnp.dot(sel_even, c_even, preferred_element_type=jnp.float32)
                  + jnp.dot(sel_odd, c_odd, preferred_element_type=jnp.float32)
                  + bias_o)                                              # (half, Opad)
        logits = jnp.where(valid, logits, -1e30)
        m = jnp.max(logits, axis=1, keepdims=True)
        e = jnp.exp(logits - m)
        return e * pl.reciprocal(jnp.sum(e, axis=1, keepdims=True))

    out_ref[0:half, :] = head(a0)
    out_ref[half:B, :] = head(a1)


# ------------------------------- wrapper --------------------------------------

def doc2vec_forward(sentence, params):
    """sentence: (S, B) int32 token ids -> (B, O) softmax probabilities."""
    # Embedding gather stays in XLA (data-dependent gather; no rectangular tile).
    emb = params["embedding"][sentence]                          # (S, B, E)
    S, B, E = emb.shape
    H = params["h0"].shape[2]
    O = params["lin_w"].shape[1]
    assert B % 2 == 0, "head layout (torch .view(-1, 2H)) handled for even batch"

    Opad = ((O + 127) // 128) * 128
    lw_pad = jnp.zeros((2 * H, Opad), jnp.float32).at[:, :O].set(params["lin_w"])
    lb_pad = jnp.zeros((1, Opad), jnp.float32).at[:, :O].set(params["lin_b"])

    vmem = pl.BlockSpec(memory_space=pltpu.MemorySpace.VMEM)
    kernel = functools.partial(_doc2vec_kernel, out_size=O)

    # TODO(synk): at realistic (S, B) sizes, stream emb over S with a BlockSpec
    # pipeline, add a parallel grid over B (v7x megacore) and cast weights/emb
    # to bf16 on v6e/v7x; toy shapes here fit whole in VMEM.
    out_pad = pl.pallas_call(
        kernel,
        out_shape=jax.ShapeDtypeStruct((B, Opad), jnp.float32),
        in_specs=[vmem] * 8,
        out_specs=vmem,
    )(emb, params["h0"], params["c0"], params["wih"], params["whh"],
      params["b"], lw_pad, lb_pad)

    return out_pad[:, :O]


# -------------------------- deterministic params ------------------------------

def init_params(key, vocab, E, H, O, B):
    ks = jax.random.split(key, 14)

    def rnd(k, shape, scale=0.1):
        return (scale * jax.random.normal(k, shape)).astype(jnp.float32)

    embedding = rnd(ks[0], (vocab, E), 1.0)

    wih_dirs, whh_dirs, b_dirs = [], [], []
    for d in range(2):
        # PyTorch LSTM parameter layout per direction: rows [i; f; g; o], each H.
        w_ih = rnd(ks[1 + 4 * d], (4 * H, E))
        w_hh = rnd(ks[2 + 4 * d], (4 * H, H))
        b_ih = rnd(ks[3 + 4 * d], (4 * H,))
        b_hh = rnd(ks[4 + 4 * d], (4 * H,))
        wih_dirs.append(w_ih.T)                    # (E, 4H)  gate-fused for x @ W
        whh_dirs.append(w_hh.T)                    # (H, 4H)
        b_dirs.append((b_ih + b_hh)[None, :])      # (1, 4H)

    params = dict(
        embedding=embedding,
        wih=jnp.concatenate(wih_dirs, axis=1),     # (E, 8H): both dirs, 256-wide N
        whh=jnp.stack(whh_dirs),                   # (2, H, 4H)
        b=jnp.stack(b_dirs),                       # (2, 1, 4H)
        # TODO(synk): the torch module draws h0/c0 with torch.randn on every
        # forward; here they are fixed deterministic random initial states.
        h0=rnd(ks[9], (2, B, H), 1.0),
        c0=rnd(ks[10], (2, B, H), 1.0),
        lin_w=rnd(ks[11], (O, 2 * H)).T,           # (2H, O) for x @ W
        lin_b=rnd(ks[12], (1, O)),
    )
    return params


# ---------------------------- pure-JAX reference ------------------------------

def reference_forward(sentence, params):
    emb = params["embedding"][sentence]
    S = emb.shape[0]
    H = params["h0"].shape[2]
    G = 4 * H

    def run_dir(d, ts):
        h, c = params["h0"][d], params["c0"][d]
        w_x = params["wih"][:, d * G:(d + 1) * G]
        w_h = params["whh"][d]
        bb = params["b"][d]
        for t in ts:
            g = emb[t] @ w_x + h @ w_h + bb
            i = jax.nn.sigmoid(g[:, 0:H])
            f = jax.nn.sigmoid(g[:, H:2 * H])
            gg = jnp.tanh(g[:, 2 * H:3 * H])
            o = jax.nn.sigmoid(g[:, 3 * H:4 * H])
            c = f * c + i * gg
            h = o * jnp.tanh(c)
        return h, c

    h_f, c_f = run_dir(0, range(S))
    h_b, c_b = run_dir(1, range(S - 1, -1, -1))
    added = jnp.stack([h_f + c_f, h_b + c_b])
    added = added / jnp.sqrt(jnp.sum(added * added))
    logits = added.reshape(-1, 2 * H) @ params["lin_w"] + params["lin_b"]
    return jax.nn.softmax(logits, axis=1)


# ---------------------------------- main --------------------------------------

if __name__ == "__main__":
    VOCAB, E, H, O, B, S = 50, 16, 32, 10, 4, 8   # small shapes
    key = jax.random.PRNGKey(0)
    k_param, k_data = jax.random.split(key)

    params = init_params(k_param, VOCAB, E, H, O, B)
    sentence = jax.random.randint(k_data, (S, B), 0, VOCAB, dtype=jnp.int32)

    out = doc2vec_forward(sentence, params)
    out = jax.block_until_ready(out)

    ref = reference_forward(sentence, params)
    assert out.shape == (B, O)
    np.testing.assert_allclose(np.asarray(out), np.asarray(ref), atol=1e-4, rtol=1e-4)

    print("KERNEL_OK")
</pallas_src>

<mosaic_0001>
module attributes {stable_mosaic.version = 11 : i64} {
  func.func @_doc2vec_kernel(%arg0: memref<8x4x16xf32, #tpu.memory_space<vmem>>, %arg1: memref<2x4x32xf32, #tpu.memory_space<vmem>>, %arg2: memref<2x4x32xf32, #tpu.memory_space<vmem>>, %arg3: memref<16x256xf32, #tpu.memory_space<vmem>>, %arg4: memref<2x32x128xf32, #tpu.memory_space<vmem>>, %arg5: memref<2x1x128xf32, #tpu.memory_space<vmem>>, %arg6: memref<64x128xf32, #tpu.memory_space<vmem>>, %arg7: memref<1x128xf32, #tpu.memory_space<vmem>>, %arg8: memref<4x128xf32, #tpu.memory_space<vmem>>) attributes {dimension_semantics = [], scalar_prefetch = 0 : i64, scratch_operands = 0 : i64, tpu.core_type = #tpu.core_type<tc>} {
    %c0 = arith.constant 0 : index
    %c0_0 = arith.constant 0 : index
    %0 = vector.load %arg3[%c0, %c0_0] : memref<16x256xf32, #tpu.memory_space<vmem>>, vector<16x256xf32>
    %c0_1 = arith.constant 0 : index
    %c0_2 = arith.constant 0 : index
    %c0_3 = arith.constant 0 : index
    %1 = vector.load %arg0[%c0_1, %c0_2, %c0_3] : memref<8x4x16xf32, #tpu.memory_space<vmem>>, vector<1x4x16xf32>
    %2 = vector.shape_cast %1 : vector<1x4x16xf32> to vector<4x16xf32>
    %cst = arith.constant dense<0.000000e+00> : vector<4x256xf32>
    %3 = tpu.matmul %2, %0, %cst {dimension_numbers = #tpu.dot_dimension_numbers<[1], [0], [0], [1], [0, 0, 1, 1], [], []>} : vector<4x16xf32>, vector<16x256xf32>, vector<4x256xf32> -> vector<4x256xf32>
    %c1 = arith.constant 1 : index
    %c0_4 = arith.constant 0 : index
    %c0_5 = arith.constant 0 : index
    %4 = vector.load %arg0[%c1, %c0_4, %c0_5] : memref<8x4x16xf32, #tpu.memory_space<vmem>>, vector<1x4x16xf32>
    %5 = vector.shape_cast %4 : vector<1x4x16xf32> to vector<4x16xf32>
    %cst_6 = arith.constant dense<0.000000e+00> : vector<4x256xf32>
    %6 = tpu.matmul %5, %0, %cst_6 {dimension_numbers = #tpu.dot_dimension_numbers<[1], [0], [0], [1], [0, 0, 1, 1], [], []>} : vector<4x16xf32>, vector<16x256xf32>, vector<4x256xf32> -> vector<4x256xf32>
    %c2 = arith.constant 2 : index
    %c0_7 = arith.constant 0 : index
    %c0_8 = arith.constant 0 : index
    %7 = vector.load %arg0[%c2, %c0_7, %c0_8] : memref<8x4x16xf32, #tpu.memory_space<vmem>>, vector<1x4x16xf32>
    %8 = vector.shape_cast %7 : vector<1x4x16xf32> to vector<4x16xf32>
    %cst_9 = arith.constant dense<0.000000e+00> : vector<4x256xf32>
    %9 = tpu.matmul %8, %0, %cst_9 {dimension_numbers = #tpu.dot_dimension_numbers<[1], [0], [0], [1], [0, 0, 1, 1], [], []>} : vector<4x16xf32>, vector<16x256xf32>, vector<4x256xf32> -> vector<4x256xf32>
    %c3 = arith.constant 3 : index
    %c0_10 = arith.constant 0 : index
    %c0_11 = arith.constant 0 : index
    %10 = vector.load %arg0[%c3, %c0_10, %c0_11] : memref<8x4x16xf32, #tpu.memory_space<vmem>>, vector<1x4x16xf32>
    %11 = vector.shape_cast %10 : vector<1x4x16xf32> to vector<4x16xf32>
    %cst_12 = arith.constant dense<0.000000e+00> : vector<4x256xf32>
    %12 = tpu.matmul %11, %0, %cst_12 {dimension_numbers = #tpu.dot_dimension_numbers<[1], [0], [0], [1], [0, 0, 1, 1], [], []>} : vector<4x16xf32>, vector<16x256xf32>, vector<4x256xf32> -> vector<4x256xf32>
    %c4 = arith.constant 4 : index
    %c0_13 = arith.constant 0 : index
    %c0_14 = arith.constant 0 : index
    %13 = vector.load %arg0[%c4, %c0_13, %c0_14] : memref<8x4x16xf32, #tpu.memory_space<vmem>>, vector<1x4x16xf32>
    %14 = vector.shape_cast %13 : vector<1x4x16xf32> to vector<4x16xf32>
    %cst_15 = arith.constant dense<0.000000e+00> : vector<4x256xf32>
    %15 = tpu.matmul %14, %0, %cst_15 {dimension_numbers = #tpu.dot_dimension_numbers<[1], [0], [0], [1], [0, 0, 1, 1], [], []>} : vector<4x16xf32>, vector<16x256xf32>, vector<4x256xf32> -> vector<4x256xf32>
    %c5 = arith.constant 5 : index
    %c0_16 = arith.constant 0 : index
    %c0_17 = arith.constant 0 : index
    %16 = vector.load %arg0[%c5, %c0_16, %c0_17] : memref<8x4x16xf32, #tpu.memory_space<vmem>>, vector<1x4x16xf32>
    %17 = vector.shape_cast %16 : vector<1x4x16xf32> to vector<4x16xf32>
    %cst_18 = arith.constant dense<0.000000e+00> : vector<4x256xf32>
    %18 = tpu.matmul %17, %0, %cst_18 {dimension_numbers = #tpu.dot_dimension_numbers<[1], [0], [0], [1], [0, 0, 1, 1], [], []>} : vector<4x16xf32>, vector<16x256xf32>, vector<4x256xf32> -> vector<4x256xf32>
    %c6 = arith.constant 6 : index
    %c0_19 = arith.constant 0 : index
    %c0_20 = arith.constant 0 : index
    %19 = vector.load %arg0[%c6, %c0_19, %c0_20] : memref<8x4x16xf32, #tpu.memory_space<vmem>>, vector<1x4x16xf32>
    %20 = vector.shape_cast %19 : vector<1x4x16xf32> to vector<4x16xf32>
    %cst_21 = arith.constant dense<0.000000e+00> : vector<4x256xf32>
    %21 = tpu.matmul %20, %0, %cst_21 {dimension_numbers = #tpu.dot_dimension_numbers<[1], [0], [0], [1], [0, 0, 1, 1], [], []>} : vector<4x16xf32>, vector<16x256xf32>, vector<4x256xf32> -> vector<4x256xf32>
    %c7 = arith.constant 7 : index
    %c0_22 = arith.constant 0 : index
    %c0_23 = arith.constant 0 : index
    %22 = vector.load %arg0[%c7, %c0_22, %c0_23] : memref<8x4x16xf32, #tpu.memory_space<vmem>>, vector<1x4x16xf32>
    %23 = vector.shape_cast %22 : vector<1x4x16xf32> to vector<4x16xf32>
    %cst_24 = arith.constant dense<0.000000e+00> : vector<4x256xf32>
    %24 = tpu.matmul %23, %0, %cst_24 {dimension_numbers = #tpu.dot_dimension_numbers<[1], [0], [0], [1], [0, 0, 1, 1], [], []>} : vector<4x16xf32>, vector<16x256xf32>, vector<4x256xf32> -> vector<4x256xf32>
    %c0_25 = arith.constant 0 : index
    %c0_26 = arith.constant 0 : index
    %c0_27 = arith.constant 0 : index
    %25 = vector.load %arg4[%c0_25, %c0_26, %c0_27] : memref<2x32x128xf32, #tpu.memory_space<vmem>>, vector<1x32x128xf32>
    %26 = vector.shape_cast %25 : vector<1x32x128xf32> to vector<32x128xf32>
    %c1_28 = arith.constant 1 : index
    %c0_29 = arith.constant 0 : index
    %c0_30 = arith.constant 0 : index
    %27 = vector.load %arg4[%c1_28, %c0_29, %c0_30] : memref<2x32x128xf32, #tpu.memory_space<vmem>>, vector<1x32x128xf32>
    %28 = vector.shape_cast %27 : vector<1x32x128xf32> to vector<32x128xf32>
    %c0_31 = arith.constant 0 : index
    %c0_32 = arith.constant 0 : index
    %c0_33 = arith.constant 0 : index
    %29 = vector.load %arg5[%c0_31, %c0_32, %c0_33] : memref<2x1x128xf32, #tpu.memory_space<vmem>>, vector<1x1x128xf32>
    %30 = vector.shape_cast %29 : vector<1x1x128xf32> to vector<1x128xf32>
    %c1_34 = arith.constant 1 : index
    %c0_35 = arith.constant 0 : index
    %c0_36 = arith.constant 0 : index
    %31 = vector.load %arg5[%c1_34, %c0_35, %c0_36] : memref<2x1x128xf32, #tpu.memory_space<vmem>>, vector<1x1x128xf32>
    %32 = vector.shape_cast %31 : vector<1x1x128xf32> to vector<1x128xf32>
    %c0_37 = arith.constant 0 : index
    %c0_38 = arith.constant 0 : index
    %c0_39 = arith.constant 0 : index
    %33 = vector.load %arg1[%c0_37, %c0_38, %c0_39] : memref<2x4x32xf32, #tpu.memory_space<vmem>>, vector<1x4x32xf32>
    %34 = vector.shape_cast %33 : vector<1x4x32xf32> to vector<4x32xf32>
    %c0_40 = arith.constant 0 : index
    %c0_41 = arith.constant 0 : index
    %c0_42 = arith.constant 0 : index
    %35 = vector.load %arg2[%c0_40, %c0_41, %c0_42] : memref<2x4x32xf32, #tpu.memory_space<vmem>>, vector<1x4x32xf32>
    %36 = vector.shape_cast %35 : vector<1x4x32xf32> to vector<4x32xf32>
    %c1_43 = arith.constant 1 : index
    %c0_44 = arith.constant 0 : index
    %c0_45 = arith.constant 0 : index
    %37 = vector.load %arg1[%c1_43, %c0_44, %c0_45] : memref<2x4x32xf32, #tpu.memory_space<vmem>>, vector<1x4x32xf32>
    %38 = vector.shape_cast %37 : vector<1x4x32xf32> to vector<4x32xf32>
    %c1_46 = arith.constant 1 : index
    %c0_47 = arith.constant 0 : index
    %c0_48 = arith.constant 0 : index
    %39 = vector.load %arg2[%c1_46, %c0_47, %c0_48] : memref<2x4x32xf32, #tpu.memory_space<vmem>>, vector<1x4x32xf32>
    %40 = vector.shape_cast %39 : vector<1x4x32xf32> to vector<4x32xf32>
    %41 = vector.extract_strided_slice %3 {offsets = [0, 0], sizes = [4, 128], strides = [1, 1]} : vector<4x256xf32> to vector<4x128xf32>
    %cst_49 = arith.constant dense<0.000000e+00> : vector<4x128xf32>
    %42 = tpu.matmul %34, %26, %cst_49 {dimension_numbers = #tpu.dot_dimension_numbers<[1], [0], [0], [1], [0, 0, 1, 1], [], []>} : vector<4x32xf32>, vector<32x128xf32>, vector<4x128xf32> -> vector<4x128xf32>
    %43 = arith.addf %41, %42 : vector<4x128xf32>
    %44 = vector.broadcast %30 : vector<1x128xf32> to vector<4x128xf32>
    %45 = arith.addf %43, %44 : vector<4x128xf32>
    %46 = vector.extract_strided_slice %45 {offsets = [0, 0], sizes = [4, 32], strides = [1, 1]} : vector<4x128xf32> to vector<4x32xf32>
    %47 = arith.negf %46 : vector<4x32xf32>
    %48 = math.exp %47 : vector<4x32xf32>
    %cst_50 = arith.constant 1.000000e+00 : f32
    %49 = vector.broadcast %cst_50 : f32 to vector<4x32xf32>
    %50 = arith.addf %49, %48 : vector<4x32xf32>
    %51 = arith.divf %49, %50 : vector<4x32xf32>
    %52 = vector.extract_strided_slice %45 {offsets = [0, 32], sizes = [4, 32], strides = [1, 1]} : vector<4x128xf32> to vector<4x32xf32>
    %53 = arith.negf %52 : vector<4x32xf32>
    %54 = math.exp %53 : vector<4x32xf32>
    %cst_51 = arith.constant 1.000000e+00 : f32
    %55 = vector.broadcast %cst_51 : f32 to vector<4x32xf32>
    %56 = arith.addf %55, %54 : vector<4x32xf32>
    %57 = arith.divf %55, %56 : vector<4x32xf32>
    %58 = vector.extract_strided_slice %45 {offsets = [0, 64], sizes = [4, 32], strides = [1, 1]} : vector<4x128xf32> to vector<4x32xf32>
    %59 = math.tanh %58 : vector<4x32xf32>
    %60 = vector.extract_strided_slice %45 {offsets = [0, 96], sizes = [4, 32], strides = [1, 1]} : vector<4x128xf32> to vector<4x32xf32>
    %61 = arith.negf %60 : vector<4x32xf32>
    %62 = math.exp %61 : vector<4x32xf32>
    %cst_52 = arith.constant 1.000000e+00 : f32
    %63 = vector.broadcast %cst_52 : f32 to vector<4x32xf32>
    %64 = arith.addf %63, %62 : vector<4x32xf32>
    %65 = arith.divf %63, %64 : vector<4x32xf32>
    %66 = arith.mulf %57, %36 : vector<4x32xf32>
    %67 = arith.mulf %51, %59 : vector<4x32xf32>
    %68 = arith.addf %66, %67 : vector<4x32xf32>
    %69 = math.tanh %68 : vector<4x32xf32>
    %70 = arith.mulf %65, %69 : vector<4x32xf32>
    %71 = vector.extract_strided_slice %24 {offsets = [0, 128], sizes = [4, 128], strides = [1, 1]} : vector<4x256xf32> to vector<4x128xf32>
    %cst_53 = arith.constant dense<0.000000e+00> : vector<4x128xf32>
    %72 = tpu.matmul %38, %28, %cst_53 {dimension_numbers = #tpu.dot_dimension_numbers<[1], [0], [0], [1], [0, 0, 1, 1], [], []>} : vector<4x32xf32>, vector<32x128xf32>, vector<4x128xf32> -> vector<4x128xf32>
    %73 = arith.addf %71, %72 : vector<4x128xf32>
    %74 = vector.broadcast %32 : vector<1x128xf32> to vector<4x128xf32>
    %75 = arith.addf %73, %74 : vector<4x128xf32>
    %76 = vector.extract_strided_slice %75 {offsets = [0, 0], sizes = [4, 32], strides = [1, 1]} : vector<4x128xf32> to vector<4x32xf32>
    %77 = arith.negf %76 : vector<4x32xf32>
    %78 = math.exp %77 : vector<4x32xf32>
    %cst_54 = arith.constant 1.000000e+00 : f32
    %79 = vector.broadcast %cst_54 : f32 to vector<4x32xf32>
    %80 = arith.addf %79, %78 : vector<4x32xf32>
    %81 = arith.divf %79, %80 : vector<4x32xf32>
    %82 = vector.extract_strided_slice %75 {offsets = [0, 32], sizes = [4, 32], strides = [1, 1]} : vector<4x128xf32> to vector<4x32xf32>
    %83 = arith.negf %82 : vector<4x32xf32>
    %84 = math.exp %83 : vector<4x32xf32>
    %cst_55 = arith.constant 1.000000e+00 : f32
    %85 = vector.broadcast %cst_55 : f32 to vector<4x32xf32>
    %86 = arith.addf %85, %84 : vector<4x32xf32>
    %87 = arith.divf %85, %86 : vector<4x32xf32>
    %88 = vector.extract_strided_slice %75 {offsets = [0, 64], sizes = [4, 32], strides = [1, 1]} : vector<4x128xf32> to vector<4x32xf32>
    %89 = math.tanh %88 : vector<4x32xf32>
    %90 = vector.extract_strided_slice %75 {offsets = [0, 96], sizes = [4, 32], strides = [1, 1]} : vector<4x128xf32> to vector<4x32xf32>
    %91 = arith.negf %90 : vector<4x32xf32>
    %92 = math.exp %91 : vector<4x32xf32>
    %cst_56 = arith.constant 1.000000e+00 : f32
    %93 = vector.broadcast %cst_56 : f32 to vector<4x32xf32>
    %94 = arith.addf %93, %92 : vector<4x32xf32>
    %95 = arith.divf %93, %94 : vector<4x32xf32>
    %96 = arith.mulf %87, %40 : vector<4x32xf32>
    %97 = arith.mulf %81, %89 : vector<4x32xf32>
    %98 = arith.addf %96, %97 : vector<4x32xf32>
    %99 = math.tanh %98 : vector<4x32xf32>
    %100 = arith.mulf %95, %99 : vector<4x32xf32>
    %101 = vector.extract_strided_slice %6 {offsets = [0, 0], sizes = [4, 128], strides = [1, 1]} : vector<4x256xf32> to vector<4x128xf32>
    %cst_57 = arith.constant dense<0.000000e+00> : vector<4x128xf32>
    %102 = tpu.matmul %70, %26, %cst_57 {dimension_numbers = #tpu.dot_dimension_numbers<[1], [0], [0], [1], [0, 0, 1, 1], [], []>} : vector<4x32xf32>, vector<32x128xf32>, vector<4x128xf32> -> vector<4x128xf32>
    %103 = arith.addf %101, %102 : vector<4x128xf32>
    %104 = vector.broadcast %30 : vector<1x128xf32> to vector<4x128xf32>
    %105 = arith.addf %103, %104 : vector<4x128xf32>
    %106 = vector.extract_strided_slice %105 {offsets = [0, 0], sizes = [4, 32], strides = [1, 1]} : vector<4x128xf32> to vector<4x32xf32>
    %107 = arith.negf %106 : vector<4x32xf32>
    %108 = math.exp %107 : vector<4x32xf32>
    %cst_58 = arith.constant 1.000000e+00 : f32
    %109 = vector.broadcast %cst_58 : f32 to vector<4x32xf32>
    %110 = arith.addf %109, %108 : vector<4x32xf32>
    %111 = arith.divf %109, %110 : vector<4x32xf32>
    %112 = vector.extract_strided_slice %105 {offsets = [0, 32], sizes = [4, 32], strides = [1, 1]} : vector<4x128xf32> to vector<4x32xf32>
    %113 = arith.negf %112 : vector<4x32xf32>
    %114 = math.exp %113 : vector<4x32xf32>
    %cst_59 = arith.constant 1.000000e+00 : f32
    %115 = vector.broadcast %cst_59 : f32 to vector<4x32xf32>
    %116 = arith.addf %115, %114 : vector<4x32xf32>
    %117 = arith.divf %115, %116 : vector<4x32xf32>
    %118 = vector.extract_strided_slice %105 {offsets = [0, 64], sizes = [4, 32], strides = [1, 1]} : vector<4x128xf32> to vector<4x32xf32>
    %119 = math.tanh %118 : vector<4x32xf32>
    %120 = vector.extract_strided_slice %105 {offsets = [0, 96], sizes = [4, 32], strides = [1, 1]} : vector<4x128xf32> to vector<4x32xf32>
    %121 = arith.negf %120 : vector<4x32xf32>
    %122 = math.exp %121 : vector<4x32xf32>
    %cst_60 = arith.constant 1.000000e+00 : f32
    %123 = vector.broadcast %cst_60 : f32 to vector<4x32xf32>
    %124 = arith.addf %123, %122 : vector<4x32xf32>
    %125 = arith.divf %123, %124 : vector<4x32xf32>
    %126 = arith.mulf %117, %68 : vector<4x32xf32>
    %127 = arith.mulf %111, %119 : vector<4x32xf32>
    %128 = arith.addf %126, %127 : vector<4x32xf32>
    %129 = math.tanh %128 : vector<4x32xf32>
    %130 = arith.mulf %125, %129 : vector<4x32xf32>
    %131 = vector.extract_strided_slice %21 {offsets = [0, 128], sizes = [4, 128], strides = [1, 1]} : vector<4x256xf32> to vector<4x128xf32>
    %cst_61 = arith.constant dense<0.000000e+00> : vector<4x128xf32>
    %132 = tpu.matmul %100, %28, %cst_61 {dimension_numbers = #tpu.dot_dimension_numbers<[1], [0], [0], [1], [0, 0, 1, 1], [], []>} : vector<4x32xf32>, vector<32x128xf32>, vector<4x128xf32> -> vector<4x128xf32>
    %133 = arith.addf %131, %132 : vector<4x128xf32>
    %134 = vector.broadcast %32 : vector<1x128xf32> to vector<4x128xf32>
    %135 = arith.addf %133, %134 : vector<4x128xf32>
    %136 = vector.extract_strided_slice %135 {offsets = [0, 0], sizes = [4, 32], strides = [1, 1]} : vector<4x128xf32> to vector<4x32xf32>
    %137 = arith.negf %136 : vector<4x32xf32>
    %138 = math.exp %137 : vector<4x32xf32>
    %cst_62 = arith.constant 1.000000e+00 : f32
    %139 = vector.broadcast %cst_62 : f32 to vector<4x32xf32>
    %140 = arith.addf %139, %138 : vector<4x32xf32>
    %141 = arith.divf %139, %140 : vector<4x32xf32>
    %142 = vector.extract_strided_slice %135 {offsets = [0, 32], sizes = [4, 32], strides = [1, 1]} : vector<4x128xf32> to vector<4x32xf32>
    %143 = arith.negf %142 : vector<4x32xf32>
    %144 = math.exp %143 : vector<4x32xf32>
    %cst_63 = arith.constant 1.000000e+00 : f32
    %145 = vector.broadcast %cst_63 : f32 to vector<4x32xf32>
    %146 = arith.addf %145, %144 : vector<4x32xf32>
    %147 = arith.divf %145, %146 : vector<4x32xf32>
    %148 = vector.extract_strided_slice %135 {offsets = [0, 64], sizes = [4, 32], strides = [1, 1]} : vector<4x128xf32> to vector<4x32xf32>
    %149 = math.tanh %148 : vector<4x32xf32>
    %150 = vector.extract_strided_slice %135 {offsets = [0, 96], sizes = [4, 32], strides = [1, 1]} : vector<4x128xf32> to vector<4x32xf32>
    %151 = arith.negf %150 : vector<4x32xf32>
    %152 = math.exp %151 : vector<4x32xf32>
    %cst_64 = arith.constant 1.000000e+00 : f32
    %153 = vector.broadcast %cst_64 : f32 to vector<4x32xf32>
    %154 = arith.addf %153, %152 : vector<4x32xf32>
    %155 = arith.divf %153, %154 : vector<4x32xf32>
    %156 = arith.mulf %147, %98 : vector<4x32xf32>
    %157 = arith.mulf %141, %149 : vector<4x32xf32>
    %158 = arith.addf %156, %157 : vector<4x32xf32>
    %159 = math.tanh %158 : vector<4x32xf32>
    %160 = arith.mulf %155, %159 : vector<4x32xf32>
    %161 = vector.extract_strided_slice %9 {offsets = [0, 0], sizes = [4, 128], strides = [1, 1]} : vector<4x256xf32> to vector<4x128xf32>
    %cst_65 = arith.constant dense<0.000000e+00> : vector<4x128xf32>
    %162 = tpu.matmul %130, %26, %cst_65 {dimension_numbers = #tpu.dot_dimension_numbers<[1], [0], [0], [1], [0, 0, 1, 1], [], []>} : vector<4x32xf32>, vector<32x128xf32>, vector<4x128xf32> -> vector<4x128xf32>
    %163 = arith.addf %161, %162 : vector<4x128xf32>
    %164 = vector.broadcast %30 : vector<1x128xf32> to vector<4x128xf32>
    %165 = arith.addf %163, %164 : vector<4x128xf32>
    %166 = vector.extract_strided_slice %165 {offsets = [0, 0], sizes = [4, 32], strides = [1, 1]} : vector<4x128xf32> to vector<4x32xf32>
    %167 = arith.negf %166 : vector<4x32xf32>
    %168 = math.exp %167 : vector<4x32xf32>
    %cst_66 = arith.constant 1.000000e+00 : f32
    %169 = vector.broadcast %cst_66 : f32 to vector<4x32xf32>
    %170 = arith.addf %169, %168 : vector<4x32xf32>
    %171 = arith.divf %169, %170 : vector<4x32xf32>
    %172 = vector.extract_strided_slice %165 {offsets = [0, 32], sizes = [4, 32], strides = [1, 1]} : vector<4x128xf32> to vector<4x32xf32>
    %173 = arith.negf %172 : vector<4x32xf32>
    %174 = math.exp %173 : vector<4x32xf32>
    %cst_67 = arith.constant 1.000000e+00 : f32
    %175 = vector.broadcast %cst_67 : f32 to vector<4x32xf32>
    %176 = arith.addf %175, %174 : vector<4x32xf32>
    %177 = arith.divf %175, %176 : vector<4x32xf32>
    %178 = vector.extract_strided_slice %165 {offsets = [0, 64], sizes = [4, 32], strides = [1, 1]} : vector<4x128xf32> to vector<4x32xf32>
    %179 = math.tanh %178 : vector<4x32xf32>
    %180 = vector.extract_strided_slice %165 {offsets = [0, 96], sizes = [4, 32], strides = [1, 1]} : vector<4x128xf32> to vector<4x32xf32>
    %181 = arith.negf %180 : vector<4x32xf32>
    %182 = math.exp %181 : vector<4x32xf32>
    %cst_68 = arith.constant 1.000000e+00 : f32
    %183 = vector.broadcast %cst_68 : f32 to vector<4x32xf32>
    %184 = arith.addf %183, %182 : vector<4x32xf32>
    %185 = arith.divf %183, %184 : vector<4x32xf32>
    %186 = arith.mulf %177, %128 : vector<4x32xf32>
    %187 = arith.mulf %171, %179 : vector<4x32xf32>
    %188 = arith.addf %186, %187 : vector<4x32xf32>
    %189 = math.tanh %188 : vector<4x32xf32>
    %190 = arith.mulf %185, %189 : vector<4x32xf32>
    %191 = vector.extract_strided_slice %18 {offsets = [0, 128], sizes = [4, 128], strides = [1, 1]} : vector<4x256xf32> to vector<4x128xf32>
    %cst_69 = arith.constant dense<0.000000e+00> : vector<4x128xf32>
    %192 = tpu.matmul %160, %28, %cst_69 {dimension_numbers = #tpu.dot_dimension_numbers<[1], [0], [0], [1], [0, 0, 1, 1], [], []>} : vector<4x32xf32>, vector<32x128xf32>, vector<4x128xf32> -> vector<4x128xf32>
    %193 = arith.addf %191, %192 : vector<4x128xf32>
    %194 = vector.broadcast %32 : vector<1x128xf32> to vector<4x128xf32>
    %195 = arith.addf %193, %194 : vector<4x128xf32>
    %196 = vector.extract_strided_slice %195 {offsets = [0, 0], sizes = [4, 32], strides = [1, 1]} : vector<4x128xf32> to vector<4x32xf32>
    %197 = arith.negf %196 : vector<4x32xf32>
    %198 = math.exp %197 : vector<4x32xf32>
    %cst_70 = arith.constant 1.000000e+00 : f32
    %199 = vector.broadcast %cst_70 : f32 to vector<4x32xf32>
    %200 = arith.addf %199, %198 : vector<4x32xf32>
    %201 = arith.divf %199, %200 : vector<4x32xf32>
    %202 = vector.extract_strided_slice %195 {offsets = [0, 32], sizes = [4, 32], strides = [1, 1]} : vector<4x128xf32> to vector<4x32xf32>
    %203 = arith.negf %202 : vector<4x32xf32>
    %204 = math.exp %203 : vector<4x32xf32>
    %cst_71 = arith.constant 1.000000e+00 : f32
    %205 = vector.broadcast %cst_71 : f32 to vector<4x32xf32>
    %206 = arith.addf %205, %204 : vector<4x32xf32>
    %207 = arith.divf %205, %206 : vector<4x32xf32>
    %208 = vector.extract_strided_slice %195 {offsets = [0, 64], sizes = [4, 32], strides = [1, 1]} : vector<4x128xf32> to vector<4x32xf32>
    %209 = math.tanh %208 : vector<4x32xf32>
    %210 = vector.extract_strided_slice %195 {offsets = [0, 96], sizes = [4, 32], strides = [1, 1]} : vector<4x128xf32> to vector<4x32xf32>
    %211 = arith.negf %210 : vector<4x32xf32>
    %212 = math.exp %211 : vector<4x32xf32>
    %cst_72 = arith.constant 1.000000e+00 : f32
    %213 = vector.broadcast %cst_72 : f32 to vector<4x32xf32>
    %214 = arith.addf %213, %212 : vector<4x32xf32>
    %215 = arith.divf %213, %214 : vector<4x32xf32>
    %216 = arith.mulf %207, %158 : vector<4x32xf32>
    %217 = arith.mulf %201, %209 : vector<4x32xf32>
    %218 = arith.addf %216, %217 : vector<4x32xf32>
    %219 = math.tanh %218 : vector<4x32xf32>
    %220 = arith.mulf %215, %219 : vector<4x32xf32>
    %221 = vector.extract_strided_slice %12 {offsets = [0, 0], sizes = [4, 128], strides = [1, 1]} : vector<4x256xf32> to vector<4x128xf32>
    %cst_73 = arith.constant dense<0.000000e+00> : vector<4x128xf32>
    %222 = tpu.matmul %190, %26, %cst_73 {dimension_numbers = #tpu.dot_dimension_numbers<[1], [0], [0], [1], [0, 0, 1, 1], [], []>} : vector<4x32xf32>, vector<32x128xf32>, vector<4x128xf32> -> vector<4x128xf32>
    %223 = arith.addf %221, %222 : vector<4x128xf32>
    %224 = vector.broadcast %30 : vector<1x128xf32> to vector<4x128xf32>
    %225 = arith.addf %223, %224 : vector<4x128xf32>
    %226 = vector.extract_strided_slice %225 {offsets = [0, 0], sizes = [4, 32], strides = [1, 1]} : vector<4x128xf32> to vector<4x32xf32>
    %227 = arith.negf %226 : vector<4x32xf32>
    %228 = math.exp %227 : vector<4x32xf32>
    %cst_74 = arith.constant 1.000000e+00 : f32
    %229 = vector.broadcast %cst_74 : f32 to vector<4x32xf32>
    %230 = arith.addf %229, %228 : vector<4x32xf32>
    %231 = arith.divf %229, %230 : vector<4x32xf32>
    %232 = vector.extract_strided_slice %225 {offsets = [0, 32], sizes = [4, 32], strides = [1, 1]} : vector<4x128xf32> to vector<4x32xf32>
    %233 = arith.negf %232 : vector<4x32xf32>
    %234 = math.exp %233 : vector<4x32xf32>
    %cst_75 = arith.constant 1.000000e+00 : f32
    %235 = vector.broadcast %cst_75 : f32 to vector<4x32xf32>
    %236 = arith.addf %235, %234 : vector<4x32xf32>
    %237 = arith.divf %235, %236 : vector<4x32xf32>
    %238 = vector.extract_strided_slice %225 {offsets = [0, 64], sizes = [4, 32], strides = [1, 1]} : vector<4x128xf32> to vector<4x32xf32>
    %239 = math.tanh %238 : vector<4x32xf32>
    %240 = vector.extract_strided_slice %225 {offsets = [0, 96], sizes = [4, 32], strides = [1, 1]} : vector<4x128xf32> to vector<4x32xf32>
    %241 = arith.negf %240 : vector<4x32xf32>
    %242 = math.exp %241 : vector<4x32xf32>
    %cst_76 = arith.constant 1.000000e+00 : f32
    %243 = vector.broadcast %cst_76 : f32 to vector<4x32xf32>
    %244 = arith.addf %243, %242 : vector<4x32xf32>
    %245 = arith.divf %243, %244 : vector<4x32xf32>
    %246 = arith.mulf %237, %188 : vector<4x32xf32>
    %247 = arith.mulf %231, %239 : vector<4x32xf32>
    %248 = arith.addf %246, %247 : vector<4x32xf32>
    %249 = math.tanh %248 : vector<4x32xf32>
    %250 = arith.mulf %245, %249 : vector<4x32xf32>
    %251 = vector.extract_strided_slice %15 {offsets = [0, 128], sizes = [4, 128], strides = [1, 1]} : vector<4x256xf32> to vector<4x128xf32>
    %cst_77 = arith.constant dense<0.000000e+00> : vector<4x128xf32>
    %252 = tpu.matmul %220, %28, %cst_77 {dimension_numbers = #tpu.dot_dimension_numbers<[1], [0], [0], [1], [0, 0, 1, 1], [], []>} : vector<4x32xf32>, vector<32x128xf32>, vector<4x128xf32> -> vector<4x128xf32>
    %253 = arith.addf %251, %252 : vector<4x128xf32>
    %254 = vector.broadcast %32 : vector<1x128xf32> to vector<4x128xf32>
    %255 = arith.addf %253, %254 : vector<4x128xf32>
    %256 = vector.extract_strided_slice %255 {offsets = [0, 0], sizes = [4, 32], strides = [1, 1]} : vector<4x128xf32> to vector<4x32xf32>
    %257 = arith.negf %256 : vector<4x32xf32>
    %258 = math.exp %257 : vector<4x32xf32>
    %cst_78 = arith.constant 1.000000e+00 : f32
    %259 = vector.broadcast %cst_78 : f32 to vector<4x32xf32>
    %260 = arith.addf %259, %258 : vector<4x32xf32>
    %261 = arith.divf %259, %260 : vector<4x32xf32>
    %262 = vector.extract_strided_slice %255 {offsets = [0, 32], sizes = [4, 32], strides = [1, 1]} : vector<4x128xf32> to vector<4x32xf32>
    %263 = arith.negf %262 : vector<4x32xf32>
    %264 = math.exp %263 : vector<4x32xf32>
    %cst_79 = arith.constant 1.000000e+00 : f32
    %265 = vector.broadcast %cst_79 : f32 to vector<4x32xf32>
    %266 = arith.addf %265, %264 : vector<4x32xf32>
    %267 = arith.divf %265, %266 : vector<4x32xf32>
    %268 = vector.extract_strided_slice %255 {offsets = [0, 64], sizes = [4, 32], strides = [1, 1]} : vector<4x128xf32> to vector<4x32xf32>
    %269 = math.tanh %268 : vector<4x32xf32>
    %270 = vector.extract_strided_slice %255 {offsets = [0, 96], sizes = [4, 32], strides = [1, 1]} : vector<4x128xf32> to vector<4x32xf32>
    %271 = arith.negf %270 : vector<4x32xf32>
    %272 = math.exp %271 : vector<4x32xf32>
    %cst_80 = arith.constant 1.000000e+00 : f32
    %273 = vector.broadcast %cst_80 : f32 to vector<4x32xf32>
    %274 = arith.addf %273, %272 : vector<4x32xf32>
    %275 = arith.divf %273, %274 : vector<4x32xf32>
    %276 = arith.mulf %267, %218 : vector<4x32xf32>
    %277 = arith.mulf %261, %269 : vector<4x32xf32>
    %278 = arith.addf %276, %277 : vector<4x32xf32>
    %279 = math.tanh %278 : vector<4x32xf32>
    %280 = arith.mulf %275, %279 : vector<4x32xf32>
    %281 = vector.extract_strided_slice %15 {offsets = [0, 0], sizes = [4, 128], strides = [1, 1]} : vector<4x256xf32> to vector<4x128xf32>
    %cst_81 = arith.constant dense<0.000000e+00> : vector<4x128xf32>
    %282 = tpu.matmul %250, %26, %cst_81 {dimension_numbers = #tpu.dot_dimension_numbers<[1], [0], [0], [1], [0, 0, 1, 1], [], []>} : vector<4x32xf32>, vector<32x128xf32>, vector<4x128xf32> -> vector<4x128xf32>
    %283 = arith.addf %281, %282 : vector<4x128xf32>
    %284 = vector.broadcast %30 : vector<1x128xf32> to vector<4x128xf32>
    %285 = arith.addf %283, %284 : vector<4x128xf32>
    %286 = vector.extract_strided_slice %285 {offsets = [0, 0], sizes = [4, 32], strides = [1, 1]} : vector<4x128xf32> to vector<4x32xf32>
    %287 = arith.negf %286 : vector<4x32xf32>
    %288 = math.exp %287 : vector<4x32xf32>
    %cst_82 = arith.constant 1.000000e+00 : f32
    %289 = vector.broadcast %cst_82 : f32 to vector<4x32xf32>
    %290 = arith.addf %289, %288 : vector<4x32xf32>
    %291 = arith.divf %289, %290 : vector<4x32xf32>
    %292 = vector.extract_strided_slice %285 {offsets = [0, 32], sizes = [4, 32], strides = [1, 1]} : vector<4x128xf32> to vector<4x32xf32>
    %293 = arith.negf %292 : vector<4x32xf32>
    %294 = math.exp %293 : vector<4x32xf32>
    %cst_83 = arith.constant 1.000000e+00 : f32
    %295 = vector.broadcast %cst_83 : f32 to vector<4x32xf32>
    %296 = arith.addf %295, %294 : vector<4x32xf32>
    %297 = arith.divf %295, %296 : vector<4x32xf32>
    %298 = vector.extract_strided_slice %285 {offsets = [0, 64], sizes = [4, 32], strides = [1, 1]} : vector<4x128xf32> to vector<4x32xf32>
    %299 = math.tanh %298 : vector<4x32xf32>
    %300 = vector.extract_strided_slice %285 {offsets = [0, 96], sizes = [4, 32], strides = [1, 1]} : vector<4x128xf32> to vector<4x32xf32>
    %301 = arith.negf %300 : vector<4x32xf32>
    %302 = math.exp %301 : vector<4x32xf32>
    %cst_84 = arith.constant 1.000000e+00 : f32
    %303 = vector.broadcast %cst_84 : f32 to vector<4x32xf32>
    %304 = arith.addf %303, %302 : vector<4x32xf32>
    %305 = arith.divf %303, %304 : vector<4x32xf32>
    %306 = arith.mulf %297, %248 : vector<4x32xf32>
    %307 = arith.mulf %291, %299 : vector<4x32xf32>
    %308 = arith.addf %306, %307 : vector<4x32xf32>
    %309 = math.tanh %308 : vector<4x32xf32>
    %310 = arith.mulf %305, %309 : vector<4x32xf32>
    %311 = vector.extract_strided_slice %12 {offsets = [0, 128], sizes = [4, 128], strides = [1, 1]} : vector<4x256xf32> to vector<4x128xf32>
    %cst_85 = arith.constant dense<0.000000e+00> : vector<4x128xf32>
    %312 = tpu.matmul %280, %28, %cst_85 {dimension_numbers = #tpu.dot_dimension_numbers<[1], [0], [0], [1], [0, 0, 1, 1], [], []>} : vector<4x32xf32>, vector<32x128xf32>, vector<4x128xf32> -> vector<4x128xf32>
    %313 = arith.addf %311, %312 : vector<4x128xf32>
    %314 = vector.broadcast %32 : vector<1x128xf32> to vector<4x128xf32>
    %315 = arith.addf %313, %314 : vector<4x128xf32>
    %316 = vector.extract_strided_slice %315 {offsets = [0, 0], sizes = [4, 32], strides = [1, 1]} : vector<4x128xf32> to vector<4x32xf32>
    %317 = arith.negf %316 : vector<4x32xf32>
    %318 = math.exp %317 : vector<4x32xf32>
    %cst_86 = arith.constant 1.000000e+00 : f32
    %319 = vector.broadcast %cst_86 : f32 to vector<4x32xf32>
    %320 = arith.addf %319, %318 : vector<4x32xf32>
    %321 = arith.divf %319, %320 : vector<4x32xf32>
    %322 = vector.extract_strided_slice %315 {offsets = [0, 32], sizes = [4, 32], strides = [1, 1]} : vector<4x128xf32> to vector<4x32xf32>
    %323 = arith.negf %322 : vector<4x32xf32>
    %324 = math.exp %323 : vector<4x32xf32>
    %cst_87 = arith.constant 1.000000e+00 : f32
    %325 = vector.broadcast %cst_87 : f32 to vector<4x32xf32>
    %326 = arith.addf %325, %324 : vector<4x32xf32>
    %327 = arith.divf %325, %326 : vector<4x32xf32>
    %328 = vector.extract_strided_slice %315 {offsets = [0, 64], sizes = [4, 32], strides = [1, 1]} : vector<4x128xf32> to vector<4x32xf32>
    %329 = math.tanh %328 : vector<4x32xf32>
    %330 = vector.extract_strided_slice %315 {offsets = [0, 96], sizes = [4, 32], strides = [1, 1]} : vector<4x128xf32> to vector<4x32xf32>
    %331 = arith.negf %330 : vector<4x32xf32>
    %332 = math.exp %331 : vector<4x32xf32>
    %cst_88 = arith.constant 1.000000e+00 : f32
    %333 = vector.broadcast %cst_88 : f32 to vector<4x32xf32>
    %334 = arith.addf %333, %332 : vector<4x32xf32>
    %335 = arith.divf %333, %334 : vector<4x32xf32>
    %336 = arith.mulf %327, %278 : vector<4x32xf32>
    %337 = arith.mulf %321, %329 : vector<4x32xf32>
    %338 = arith.addf %336, %337 : vector<4x32xf32>
    %339 = math.tanh %338 : vector<4x32xf32>
    %340 = arith.mulf %335, %339 : vector<4x32xf32>
    %341 = vector.extract_strided_slice %18 {offsets = [0, 0], sizes = [4, 128], strides = [1, 1]} : vector<4x256xf32> to vector<4x128xf32>
    %cst_89 = arith.constant dense<0.000000e+00> : vector<4x128xf32>
    %342 = tpu.matmul %310, %26, %cst_89 {dimension_numbers = #tpu.dot_dimension_numbers<[1], [0], [0], [1], [0, 0, 1, 1], [], []>} : vector<4x32xf32>, vector<32x128xf32>, vector<4x128xf32> -> vector<4x128xf32>
    %343 = arith.addf %341, %342 : vector<4x128xf32>
    %344 = vector.broadcast %30 : vector<1x128xf32> to vector<4x128xf32>
    %345 = arith.addf %343, %344 : vector<4x128xf32>
    %346 = vector.extract_strided_slice %345 {offsets = [0, 0], sizes = [4, 32], strides = [1, 1]} : vector<4x128xf32> to vector<4x32xf32>
    %347 = arith.negf %346 : vector<4x32xf32>
    %348 = math.exp %347 : vector<4x32xf32>
    %cst_90 = arith.constant 1.000000e+00 : f32
    %349 = vector.broadcast %cst_90 : f32 to vector<4x32xf32>
    %350 = arith.addf %349, %348 : vector<4x32xf32>
    %351 = arith.divf %349, %350 : vector<4x32xf32>
    %352 = vector.extract_strided_slice %345 {offsets = [0, 32], sizes = [4, 32], strides = [1, 1]} : vector<4x128xf32> to vector<4x32xf32>
    %353 = arith.negf %352 : vector<4x32xf32>
    %354 = math.exp %353 : vector<4x32xf32>
    %cst_91 = arith.constant 1.000000e+00 : f32
    %355 = vector.broadcast %cst_91 : f32 to vector<4x32xf32>
    %356 = arith.addf %355, %354 : vector<4x32xf32>
    %357 = arith.divf %355, %356 : vector<4x32xf32>
    %358 = vector.extract_strided_slice %345 {offsets = [0, 64], sizes = [4, 32], strides = [1, 1]} : vector<4x128xf32> to vector<4x32xf32>
    %359 = math.tanh %358 : vector<4x32xf32>
    %360 = vector.extract_strided_slice %345 {offsets = [0, 96], sizes = [4, 32], strides = [1, 1]} : vector<4x128xf32> to vector<4x32xf32>
    %361 = arith.negf %360 : vector<4x32xf32>
    %362 = math.exp %361 : vector<4x32xf32>
    %cst_92 = arith.constant 1.000000e+00 : f32
    %363 = vector.broadcast %cst_92 : f32 to vector<4x32xf32>
    %364 = arith.addf %363, %362 : vector<4x32xf32>
    %365 = arith.divf %363, %364 : vector<4x32xf32>
    %366 = arith.mulf %357, %308 : vector<4x32xf32>
    %367 = arith.mulf %351, %359 : vector<4x32xf32>
    %368 = arith.addf %366, %367 : vector<4x32xf32>
    %369 = math.tanh %368 : vector<4x32xf32>
    %370 = arith.mulf %365, %369 : vector<4x32xf32>
    %371 = vector.extract_strided_slice %9 {offsets = [0, 128], sizes = [4, 128], strides = [1, 1]} : vector<4x256xf32> to vector<4x128xf32>
    %cst_93 = arith.constant dense<0.000000e+00> : vector<4x128xf32>
    %372 = tpu.matmul %340, %28, %cst_93 {dimension_numbers = #tpu.dot_dimension_numbers<[1], [0], [0], [1], [0, 0, 1, 1], [], []>} : vector<4x32xf32>, vector<32x128xf32>, vector<4x128xf32> -> vector<4x128xf32>
    %373 = arith.addf %371, %372 : vector<4x128xf32>
    %374 = vector.broadcast %32 : vector<1x128xf32> to vector<4x128xf32>
    %375 = arith.addf %373, %374 : vector<4x128xf32>
    %376 = vector.extract_strided_slice %375 {offsets = [0, 0], sizes = [4, 32], strides = [1, 1]} : vector<4x128xf32> to vector<4x32xf32>
    %377 = arith.negf %376 : vector<4x32xf32>
    %378 = math.exp %377 : vector<4x32xf32>
    %cst_94 = arith.constant 1.000000e+00 : f32
    %379 = vector.broadcast %cst_94 : f32 to vector<4x32xf32>
    %380 = arith.addf %379, %378 : vector<4x32xf32>
    %381 = arith.divf %379, %380 : vector<4x32xf32>
    %382 = vector.extract_strided_slice %375 {offsets = [0, 32], sizes = [4, 32], strides = [1, 1]} : vector<4x128xf32> to vector<4x32xf32>
    %383 = arith.negf %382 : vector<4x32xf32>
    %384 = math.exp %383 : vector<4x32xf32>
    %cst_95 = arith.constant 1.000000e+00 : f32
    %385 = vector.broadcast %cst_95 : f32 to vector<4x32xf32>
    %386 = arith.addf %385, %384 : vector<4x32xf32>
    %387 = arith.divf %385, %386 : vector<4x32xf32>
    %388 = vector.extract_strided_slice %375 {offsets = [0, 64], sizes = [4, 32], strides = [1, 1]} : vector<4x128xf32> to vector<4x32xf32>
    %389 = math.tanh %388 : vector<4x32xf32>
    %390 = vector.extract_strided_slice %375 {offsets = [0, 96], sizes = [4, 32], strides = [1, 1]} : vector<4x128xf32> to vector<4x32xf32>
    %391 = arith.negf %390 : vector<4x32xf32>
    %392 = math.exp %391 : vector<4x32xf32>
    %cst_96 = arith.constant 1.000000e+00 : f32
    %393 = vector.broadcast %cst_96 : f32 to vector<4x32xf32>
    %394 = arith.addf %393, %392 : vector<4x32xf32>
    %395 = arith.divf %393, %394 : vector<4x32xf32>
    %396 = arith.mulf %387, %338 : vector<4x32xf32>
    %397 = arith.mulf %381, %389 : vector<4x32xf32>
    %398 = arith.addf %396, %397 : vector<4x32xf32>
    %399 = math.tanh %398 : vector<4x32xf32>
    %400 = arith.mulf %395, %399 : vector<4x32xf32>
    %401 = vector.extract_strided_slice %21 {offsets = [0, 0], sizes = [4, 128], strides = [1, 1]} : vector<4x256xf32> to vector<4x128xf32>
    %cst_97 = arith.constant dense<0.000000e+00> : vector<4x128xf32>
    %402 = tpu.matmul %370, %26, %cst_97 {dimension_numbers = #tpu.dot_dimension_numbers<[1], [0], [0], [1], [0, 0, 1, 1], [], []>} : vector<4x32xf32>, vector<32x128xf32>, vector<4x128xf32> -> vector<4x128xf32>
    %403 = arith.addf %401, %402 : vector<4x128xf32>
    %404 = vector.broadcast %30 : vector<1x128xf32> to vector<4x128xf32>
    %405 = arith.addf %403, %404 : vector<4x128xf32>
    %406 = vector.extract_strided_slice %405 {offsets = [0, 0], sizes = [4, 32], strides = [1, 1]} : vector<4x128xf32> to vector<4x32xf32>
    %407 = arith.negf %406 : vector<4x32xf32>
    %408 = math.exp %407 : vector<4x32xf32>
    %cst_98 = arith.constant 1.000000e+00 : f32
    %409 = vector.broadcast %cst_98 : f32 to vector<4x32xf32>
    %410 = arith.addf %409, %408 : vector<4x32xf32>
    %411 = arith.divf %409, %410 : vector<4x32xf32>
    %412 = vector.extract_strided_slice %405 {offsets = [0, 32], sizes = [4, 32], strides = [1, 1]} : vector<4x128xf32> to vector<4x32xf32>
    %413 = arith.negf %412 : vector<4x32xf32>
    %414 = math.exp %413 : vector<4x32xf32>
    %cst_99 = arith.constant 1.000000e+00 : f32
    %415 = vector.broadcast %cst_99 : f32 to vector<4x32xf32>
    %416 = arith.addf %415, %414 : vector<4x32xf32>
    %417 = arith.divf %415, %416 : vector<4x32xf32>
    %418 = vector.extract_strided_slice %405 {offsets = [0, 64], sizes = [4, 32], strides = [1, 1]} : vector<4x128xf32> to vector<4x32xf32>
    %419 = math.tanh %418 : vector<4x32xf32>
    %420 = vector.extract_strided_slice %405 {offsets = [0, 96], sizes = [4, 32], strides = [1, 1]} : vector<4x128xf32> to vector<4x32xf32>
    %421 = arith.negf %420 : vector<4x32xf32>
    %422 = math.exp %421 : vector<4x32xf32>
    %cst_100 = arith.constant 1.000000e+00 : f32
    %423 = vector.broadcast %cst_100 : f32 to vector<4x32xf32>
    %424 = arith.addf %423, %422 : vector<4x32xf32>
    %425 = arith.divf %423, %424 : vector<4x32xf32>
    %426 = arith.mulf %417, %368 : vector<4x32xf32>
    %427 = arith.mulf %411, %419 : vector<4x32xf32>
    %428 = arith.addf %426, %427 : vector<4x32xf32>
    %429 = math.tanh %428 : vector<4x32xf32>
    %430 = arith.mulf %425, %429 : vector<4x32xf32>
    %431 = vector.extract_strided_slice %6 {offsets = [0, 128], sizes = [4, 128], strides = [1, 1]} : vector<4x256xf32> to vector<4x128xf32>
    %cst_101 = arith.constant dense<0.000000e+00> : vector<4x128xf32>
    %432 = tpu.matmul %400, %28, %cst_101 {dimension_numbers = #tpu.dot_dimension_numbers<[1], [0], [0], [1], [0, 0, 1, 1], [], []>} : vector<4x32xf32>, vector<32x128xf32>, vector<4x128xf32> -> vector<4x128xf32>
    %433 = arith.addf %431, %432 : vector<4x128xf32>
    %434 = vector.broadcast %32 : vector<1x128xf32> to vector<4x128xf32>
    %435 = arith.addf %433, %434 : vector<4x128xf32>
    %436 = vector.extract_strided_slice %435 {offsets = [0, 0], sizes = [4, 32], strides = [1, 1]} : vector<4x128xf32> to vector<4x32xf32>
    %437 = arith.negf %436 : vector<4x32xf32>
    %438 = math.exp %437 : vector<4x32xf32>
    %cst_102 = arith.constant 1.000000e+00 : f32
    %439 = vector.broadcast %cst_102 : f32 to vector<4x32xf32>
    %440 = arith.addf %439, %438 : vector<4x32xf32>
    %441 = arith.divf %439, %440 : vector<4x32xf32>
    %442 = vector.extract_strided_slice %435 {offsets = [0, 32], sizes = [4, 32], strides = [1, 1]} : vector<4x128xf32> to vector<4x32xf32>
    %443 = arith.negf %442 : vector<4x32xf32>
    %444 = math.exp %443 : vector<4x32xf32>
    %cst_103 = arith.constant 1.000000e+00 : f32
    %445 = vector.broadcast %cst_103 : f32 to vector<4x32xf32>
    %446 = arith.addf %445, %444 : vector<4x32xf32>
    %447 = arith.divf %445, %446 : vector<4x32xf32>
    %448 = vector.extract_strided_slice %435 {offsets = [0, 64], sizes = [4, 32], strides = [1, 1]} : vector<4x128xf32> to vector<4x32xf32>
    %449 = math.tanh %448 : vector<4x32xf32>
    %450 = vector.extract_strided_slice %435 {offsets = [0, 96], sizes = [4, 32], strides = [1, 1]} : vector<4x128xf32> to vector<4x32xf32>
    %451 = arith.negf %450 : vector<4x32xf32>
    %452 = math.exp %451 : vector<4x32xf32>
    %cst_104 = arith.constant 1.000000e+00 : f32
    %453 = vector.broadcast %cst_104 : f32 to vector<4x32xf32>
    %454 = arith.addf %453, %452 : vector<4x32xf32>
    %455 = arith.divf %453, %454 : vector<4x32xf32>
    %456 = arith.mulf %447, %398 : vector<4x32xf32>
    %457 = arith.mulf %441, %449 : vector<4x32xf32>
    %458 = arith.addf %456, %457 : vector<4x32xf32>
    %459 = math.tanh %458 : vector<4x32xf32>
    %460 = arith.mulf %455, %459 : vector<4x32xf32>
    %461 = vector.extract_strided_slice %24 {offsets = [0, 0], sizes = [4, 128], strides = [1, 1]} : vector<4x256xf32> to vector<4x128xf32>
    %cst_105 = arith.constant dense<0.000000e+00> : vector<4x128xf32>
    %462 = tpu.matmul %430, %26, %cst_105 {dimension_numbers = #tpu.dot_dimension_numbers<[1], [0], [0], [1], [0, 0, 1, 1], [], []>} : vector<4x32xf32>, vector<32x128xf32>, vector<4x128xf32> -> vector<4x128xf32>
    %463 = arith.addf %461, %462 : vector<4x128xf32>
    %464 = vector.broadcast %30 : vector<1x128xf32> to vector<4x128xf32>
    %465 = arith.addf %463, %464 : vector<4x128xf32>
    %466 = vector.extract_strided_slice %465 {offsets = [0, 0], sizes = [4, 32], strides = [1, 1]} : vector<4x128xf32> to vector<4x32xf32>
    %467 = arith.negf %466 : vector<4x32xf32>
    %468 = math.exp %467 : vector<4x32xf32>
    %cst_106 = arith.constant 1.000000e+00 : f32
    %469 = vector.broadcast %cst_106 : f32 to vector<4x32xf32>
    %470 = arith.addf %469, %468 : vector<4x32xf32>
    %471 = arith.divf %469, %470 : vector<4x32xf32>
    %472 = vector.extract_strided_slice %465 {offsets = [0, 32], sizes = [4, 32], strides = [1, 1]} : vector<4x128xf32> to vector<4x32xf32>
    %473 = arith.negf %472 : vector<4x32xf32>
    %474 = math.exp %473 : vector<4x32xf32>
    %cst_107 = arith.constant 1.000000e+00 : f32
    %475 = vector.broadcast %cst_107 : f32 to vector<4x32xf32>
    %476 = arith.addf %475, %474 : vector<4x32xf32>
    %477 = arith.divf %475, %476 : vector<4x32xf32>
    %478 = vector.extract_strided_slice %465 {offsets = [0, 64], sizes = [4, 32], strides = [1, 1]} : vector<4x128xf32> to vector<4x32xf32>
    %479 = math.tanh %478 : vector<4x32xf32>
    %480 = vector.extract_strided_slice %465 {offsets = [0, 96], sizes = [4, 32], strides = [1, 1]} : vector<4x128xf32> to vector<4x32xf32>
    %481 = arith.negf %480 : vector<4x32xf32>
    %482 = math.exp %481 : vector<4x32xf32>
    %cst_108 = arith.constant 1.000000e+00 : f32
    %483 = vector.broadcast %cst_108 : f32 to vector<4x32xf32>
    %484 = arith.addf %483, %482 : vector<4x32xf32>
    %485 = arith.divf %483, %484 : vector<4x32xf32>
    %486 = arith.mulf %477, %428 : vector<4x32xf32>
    %487 = arith.mulf %471, %479 : vector<4x32xf32>
    %488 = arith.addf %486, %487 : vector<4x32xf32>
    %489 = math.tanh %488 : vector<4x32xf32>
    %490 = arith.mulf %485, %489 : vector<4x32xf32>
    %491 = vector.extract_strided_slice %3 {offsets = [0, 128], sizes = [4, 128], strides = [1, 1]} : vector<4x256xf32> to vector<4x128xf32>
    %cst_109 = arith.constant dense<0.000000e+00> : vector<4x128xf32>
    %492 = tpu.matmul %460, %28, %cst_109 {dimension_numbers = #tpu.dot_dimension_numbers<[1], [0], [0], [1], [0, 0, 1, 1], [], []>} : vector<4x32xf32>, vector<32x128xf32>, vector<4x128xf32> -> vector<4x128xf32>
    %493 = arith.addf %491, %492 : vector<4x128xf32>
    %494 = vector.broadcast %32 : vector<1x128xf32> to vector<4x128xf32>
    %495 = arith.addf %493, %494 : vector<4x128xf32>
    %496 = vector.extract_strided_slice %495 {offsets = [0, 0], sizes = [4, 32], strides = [1, 1]} : vector<4x128xf32> to vector<4x32xf32>
    %497 = arith.negf %496 : vector<4x32xf32>
    %498 = math.exp %497 : vector<4x32xf32>
    %cst_110 = arith.constant 1.000000e+00 : f32
    %499 = vector.broadcast %cst_110 : f32 to vector<4x32xf32>
    %500 = arith.addf %499, %498 : vector<4x32xf32>
    %501 = arith.divf %499, %500 : vector<4x32xf32>
    %502 = vector.extract_strided_slice %495 {offsets = [0, 32], sizes = [4, 32], strides = [1, 1]} : vector<4x128xf32> to vector<4x32xf32>
    %503 = arith.negf %502 : vector<4x32xf32>
    %504 = math.exp %503 : vector<4x32xf32>
    %cst_111 = arith.constant 1.000000e+00 : f32
    %505 = vector.broadcast %cst_111 : f32 to vector<4x32xf32>
    %506 = arith.addf %505, %504 : vector<4x32xf32>
    %507 = arith.divf %505, %506 : vector<4x32xf32>
    %508 = vector.extract_strided_slice %495 {offsets = [0, 64], sizes = [4, 32], strides = [1, 1]} : vector<4x128xf32> to vector<4x32xf32>
    %509 = math.tanh %508 : vector<4x32xf32>
    %510 = vector.extract_strided_slice %495 {offsets = [0, 96], sizes = [4, 32], strides = [1, 1]} : vector<4x128xf32> to vector<4x32xf32>
    %511 = arith.negf %510 : vector<4x32xf32>
    %512 = math.exp %511 : vector<4x32xf32>
    %cst_112 = arith.constant 1.000000e+00 : f32
    %513 = vector.broadcast %cst_112 : f32 to vector<4x32xf32>
    %514 = arith.addf %513, %512 : vector<4x32xf32>
    %515 = arith.divf %513, %514 : vector<4x32xf32>
    %516 = arith.mulf %507, %458 : vector<4x32xf32>
    %517 = arith.mulf %501, %509 : vector<4x32xf32>
    %518 = arith.addf %516, %517 : vector<4x32xf32>
    %519 = math.tanh %518 : vector<4x32xf32>
    %520 = arith.mulf %515, %519 : vector<4x32xf32>
    %521 = arith.addf %490, %488 : vector<4x32xf32>
    %522 = arith.addf %520, %518 : vector<4x32xf32>
    %523 = arith.mulf %521, %521 : vector<4x32xf32>
    %524 = vector.shape_cast %523 : vector<4x32xf32> to vector<1x4x32xf32>
    %cst_113 = arith.constant dense<0.000000e+00> : vector<1xf32>
    %525 = vector.multi_reduction <add>, %524, %cst_113 [1, 2] : vector<1x4x32xf32> to vector<1xf32>
    %526 = vector.shape_cast %525 : vector<1xf32> to vector<1x1x1xf32>
    %527 = vector.extract %526[0, 0, 0] : f32 from vector<1x1x1xf32>
    %528 = arith.mulf %522, %522 : vector<4x32xf32>
    %529 = vector.shape_cast %528 : vector<4x32xf32> to vector<1x4x32xf32>
    %cst_114 = arith.constant dense<0.000000e+00> : vector<1xf32>
    %530 = vector.multi_reduction <add>, %529, %cst_114 [1, 2] : vector<1x4x32xf32> to vector<1xf32>
    %531 = vector.shape_cast %530 : vector<1xf32> to vector<1x1x1xf32>
    %532 = vector.extract %531[0, 0, 0] : f32 from vector<1x1x1xf32>
    %533 = arith.addf %527, %532 : f32
    %534 = math.rsqrt %533 : f32
    %535 = vector.broadcast %534 : f32 to vector<4x32xf32>
    %536 = arith.mulf %521, %535 : vector<4x32xf32>
    %537 = vector.broadcast %534 : f32 to vector<4x32xf32>
    %538 = arith.mulf %522, %537 : vector<4x32xf32>
    %c0_115 = arith.constant 0 : index
    %c0_116 = arith.constant 0 : index
    %539 = vector.load %arg6[%c0_115, %c0_116] : memref<64x128xf32, #tpu.memory_space<vmem>>, vector<32x128xf32>
    %c32 = arith.constant 32 : index
    %c0_117 = arith.constant 0 : index
    %540 = vector.load %arg6[%c32, %c0_117] : memref<64x128xf32, #tpu.memory_space<vmem>>, vector<32x128xf32>
    %c0_118 = arith.constant 0 : index
    %c0_119 = arith.constant 0 : index
    %541 = vector.load %arg7[%c0_118, %c0_119] : memref<1x128xf32, #tpu.memory_space<vmem>>, vector<1x128xf32>
    %542 = tpu.iota {dimensions = array<i32: 0>} : vector<2x4xi32>
    %543 = tpu.iota {dimensions = array<i32: 1>} : vector<2x4xi32>
    %c2_i32 = arith.constant 2 : i32
    %544 = vector.broadcast %c2_i32 : i32 to vector<2x4xi32>
    %545 = arith.muli %544, %542 : vector<2x4xi32>
    %546 = arith.cmpi eq, %543, %545 : vector<2x4xi32>
    %547 = arith.extui %546 : vector<2x4xi1> to vector<2x4xi32>
    %548 = arith.sitofp %547 : vector<2x4xi32> to vector<2x4xf32>
    %c2_i32_120 = arith.constant 2 : i32
    %549 = vector.broadcast %c2_i32_120 : i32 to vector<2x4xi32>
    %550 = arith.muli %549, %542 : vector<2x4xi32>
    %c1_i32 = arith.constant 1 : i32
    %551 = vector.broadcast %c1_i32 : i32 to vector<2x4xi32>
    %552 = arith.addi %550, %551 : vector<2x4xi32>
    %553 = arith.cmpi eq, %543, %552 : vector<2x4xi32>
    %554 = arith.extui %553 : vector<2x4xi1> to vector<2x4xi32>
    %555 = arith.sitofp %554 : vector<2x4xi32> to vector<2x4xf32>
    %556 = tpu.iota {dimensions = array<i32: 1>} : vector<2x128xi32>
    %c10_i32 = arith.constant 10 : i32
    %557 = vector.broadcast %c10_i32 : i32 to vector<2x128xi32>
    %558 = arith.cmpi slt, %556, %557 : vector<2x128xi32>
    %cst_121 = arith.constant dense<0.000000e+00> : vector<4x128xf32>
    %559 = tpu.matmul %536, %539, %cst_121 {dimension_numbers = #tpu.dot_dimension_numbers<[1], [0], [0], [1], [0, 0, 1, 1], [], []>} : vector<4x32xf32>, vector<32x128xf32>, vector<4x128xf32> -> vector<4x128xf32>
    %cst_122 = arith.constant dense<0.000000e+00> : vector<4x128xf32>
    %560 = tpu.matmul %536, %540, %cst_122 {dimension_numbers = #tpu.dot_dimension_numbers<[1], [0], [0], [1], [0, 0, 1, 1], [], []>} : vector<4x32xf32>, vector<32x128xf32>, vector<4x128xf32> -> vector<4x128xf32>
    %cst_123 = arith.constant dense<0.000000e+00> : vector<2x128xf32>
    %561 = tpu.matmul %548, %559, %cst_123 {dimension_numbers = #tpu.dot_dimension_numbers<[1], [0], [0], [1], [0, 0, 1, 1], [], []>} : vector<2x4xf32>, vector<4x128xf32>, vector<2x128xf32> -> vector<2x128xf32>
    %cst_124 = arith.constant dense<0.000000e+00> : vector<2x128xf32>
    %562 = tpu.matmul %555, %560, %cst_124 {dimension_numbers = #tpu.dot_dimension_numbers<[1], [0], [0], [1], [0, 0, 1, 1], [], []>} : vector<2x4xf32>, vector<4x128xf32>, vector<2x128xf32> -> vector<2x128xf32>
    %563 = arith.addf %561, %562 : vector<2x128xf32>
    %564 = vector.broadcast %541 : vector<1x128xf32> to vector<2x128xf32>
    %565 = arith.addf %563, %564 : vector<2x128xf32>
    %cst_125 = arith.constant -1.000000e+30 : f32
    %566 = vector.broadcast %cst_125 : f32 to vector<2x128xf32>
    %567 = arith.select %558, %565, %566 : vector<2x128xi1>, vector<2x128xf32>
    %cst_126 = arith.constant dense<0xFF800000> : vector<2xf32>
    %568 = vector.multi_reduction <maximumf>, %567, %cst_126 [1] : vector<2x128xf32> to vector<2xf32>
    %569 = vector.shape_cast %568 : vector<2xf32> to vector<2x1xf32>
    %570 = vector.broadcast %569 : vector<2x1xf32> to vector<2x128xf32>
    %571 = arith.subf %567, %570 : vector<2x128xf32>
    %572 = math.exp %571 : vector<2x128xf32>
    %cst_127 = arith.constant dense<0.000000e+00> : vector<2xf32>
    %573 = vector.multi_reduction <add>, %572, %cst_127 [1] : vector<2x128xf32> to vector<2xf32>
    %574 = vector.shape_cast %573 : vector<2xf32> to vector<2x1xf32>
    %575 = tpu.reciprocal %574 : vector<2x1xf32> -> vector<2x1xf32>
    %576 = vector.broadcast %575 : vector<2x1xf32> to vector<2x128xf32>
    %577 = arith.mulf %572, %576 : vector<2x128xf32>
    %c0_128 = arith.constant 0 : index
    %c0_129 = arith.constant 0 : index
    %578 = vector.load %arg8[%c0_128, %c0_129] : memref<4x128xf32, #tpu.memory_space<vmem>>, vector<2x128xf32>
    tpu.vector_store %arg8[%c0_128, %c0_129], %577 {strides = array<i32>} : memref<4x128xf32, #tpu.memory_space<vmem>>, vector<2x128xf32>,
    %cst_130 = arith.constant dense<0.000000e+00> : vector<4x128xf32>
    %579 = tpu.matmul %538, %539, %cst_130 {dimension_numbers = #tpu.dot_dimension_numbers<[1], [0], [0], [1], [0, 0, 1, 1], [], []>} : vector<4x32xf32>, vector<32x128xf32>, vector<4x128xf32> -> vector<4x128xf32>
    %cst_131 = arith.constant dense<0.000000e+00> : vector<4x128xf32>
    %580 = tpu.matmul %538, %540, %cst_131 {dimension_numbers = #tpu.dot_dimension_numbers<[1], [0], [0], [1], [0, 0, 1, 1], [], []>} : vector<4x32xf32>, vector<32x128xf32>, vector<4x128xf32> -> vector<4x128xf32>
    %cst_132 = arith.constant dense<0.000000e+00> : vector<2x128xf32>
    %581 = tpu.matmul %548, %579, %cst_132 {dimension_numbers = #tpu.dot_dimension_numbers<[1], [0], [0], [1], [0, 0, 1, 1], [], []>} : vector<2x4xf32>, vector<4x128xf32>, vector<2x128xf32> -> vector<2x128xf32>
    %cst_133 = arith.constant dense<0.000000e+00> : vector<2x128xf32>
    %582 = tpu.matmul %555, %580, %cst_133 {dimension_numbers = #tpu.dot_dimension_numbers<[1], [0], [0], [1], [0, 0, 1, 1], [], []>} : vector<2x4xf32>, vector<4x128xf32>, vector<2x128xf32> -> vector<2x128xf32>
    %583 = arith.addf %581, %582 : vector<2x128xf32>
    %584 = vector.broadcast %541 : vector<1x128xf32> to vector<2x128xf32>
    %585 = arith.addf %583, %584 : vector<2x128xf32>
    %cst_134 = arith.constant -1.000000e+30 : f32
    %586 = vector.broadcast %cst_134 : f32 to vector<2x128xf32>
    %587 = arith.select %558, %585, %586 : vector<2x128xi1>, vector<2x128xf32>
    %cst_135 = arith.constant dense<0xFF800000> : vector<2xf32>
    %588 = vector.multi_reduction <maximumf>, %587, %cst_135 [1] : vector<2x128xf32> to vector<2xf32>
    %589 = vector.shape_cast %588 : vector<2xf32> to vector<2x1xf32>
    %590 = vector.broadcast %589 : vector<2x1xf32> to vector<2x128xf32>
    %591 = arith.subf %587, %590 : vector<2x128xf32>
    %592 = math.exp %591 : vector<2x128xf32>
    %cst_136 = arith.constant dense<0.000000e+00> : vector<2xf32>
    %593 = vector.multi_reduction <add>, %592, %cst_136 [1] : vector<2x128xf32> to vector<2xf32>
    %594 = vector.shape_cast %593 : vector<2xf32> to vector<2x1xf32>
    %595 = tpu.reciprocal %594 : vector<2x1xf32> -> vector<2x1xf32>
    %596 = vector.broadcast %595 : vector<2x1xf32> to vector<2x128xf32>
    %597 = arith.mulf %592, %596 : vector<2x128xf32>
    %c2_137 = arith.constant 2 : index
    %c0_138 = arith.constant 0 : index
    %598 = vector.load %arg8[%c2_137, %c0_138] : memref<4x128xf32, #tpu.memory_space<vmem>>, vector<2x128xf32>
    tpu.vector_store %arg8[%c2_137, %c0_138], %597 {strides = array<i32>} : memref<4x128xf32, #tpu.memory_space<vmem>>, vector<2x128xf32>,
    return
  }
}

</mosaic_0001>

<bundles_post_ra>
// kernel: tpu_custom_call.1
= control target key start
LH: loop header
LB: loop body
LE: loop exit
PB: predicated region body
PF: predicated region fallthrough
CT: control target
= control target key end

     0   :  { %13 = vsyncpa [#allocation3], 0  ;;  %s4476_s0 = inlined_call_operand.hbm [shape: f32[8,4,16], index: 0, kind: input, shape index: {}]   ;;  %s4477_s1 = inlined_call_operand.hbm [shape: f32[2,4,32], index: 1, kind: input, shape index: {}]   ;;  %s4478_s2 = inlined_call_operand.hbm [shape: f32[2,4,32], index: 2, kind: input, shape index: {}]   ;;  %s4479_s3 = inlined_call_operand.hbm [shape: f32[16,256], index: 3, kind: input, shape index: {}]   ;;  %s4480_s4 = inlined_call_operand.hbm [shape: f32[2,32,128], index: 4, kind: input, shape index: {}]   ;;  %s4481_s5 = inlined_call_operand.vmem [shape: f32[2,1,128], index: 5, kind: input, shape index: {}]   ;;  %s4482_s6 = inlined_call_operand.hbm [shape: f32[64,128], index: 6, kind: input, shape index: {}]   ;;  %s4483_s7 = inlined_call_operand.vmem [shape: f32[1,128], index: 7, kind: input, shape index: {}]   ;;  %s4484_s8 = inlined_call_operand.hbm [shape: f32[4,128], index: 8, kind: output, shape index: {}]  }
   0x1   :  { %14 = vsyncpa [#allocation6], 0 }
   0x2   :  { %15 = vsyncpa [#allocation9], 0 }
   0x3   :  { %16 = vsyncpa [#allocation12], 0 }
   0x4   :  { %17 = vsyncpa [#allocation4], 0  ;;  %s3971_s27 = smov [#allocation5]   ;;  %s3972_s29 = smov [#allocation8]  }
   0x5   :  { %s35_s28 = sshll.u32 %s3971_s27, 4  ;;  %s59_s30 = sshll.u32 %s3972_s29, 4  ;;  %s36_s28 = int_to_ptr.vmem [resolvable:$true] %s35_s28  ;;  %s4033_s30 = int_to_ptr.vmem [resolvable:$true] %s59_s30 }
   0x6   :  { %s3807_s11 = scalar_lea.hbm %s4477_s1, 128 }
   0x7   :  { %p3808_p0 = scmp.ne.s32.totalorder %s4477_s1, %s3807_s11  ;;  %p3811_p1 = scmp.lt.u32.totalorder %s3807_s11, %s4477_s1 }
   0x9   :  { %p3813_p2 = pnand %p3811_p1, %p3808_p0 }
   0xb   :  { %3816 = shalt.err (!%p3813_p2)
}
   0xc   :  { %s3817_s16 = scalar_lea.vmem %s36_s28, 128  ;;  %p3822_p4 = scmp.lt.s32.totalorder %s36_s28, %s36_s28 }
   0xd   :  { %p3818_p3 = scmp.ne.s32.totalorder %s36_s28, %s3817_s16  ;;  %p3823_p5 = scmp.lt.s32.totalorder %s3817_s16, %s3817_s16 }
   0xf   :  { %p3824_p6 = por %p3823_p5, %p3822_p4 }
  0x11   :  { %p3825_p7 = pnand %p3824_p6, %p3818_p3 }
  0x13   :  { %3828 = shalt.err (!%p3825_p7)
}
  0x14   :  { %s3973_s17 = smov 64   ;;  %s3974_s18 = smov 4  }
  0x15   :  { %41 = dma.hbm_to_vmem [thread:$0]  %s4477_s1, 128, %s36_s28, [#allocation6], %s3973_s17, %s3973_s17, %s3974_s18  }
  0x16   :  { %s3829_s23 = scalar_lea.hbm %s4479_s3, 512 }
  0x17   :  { %p3830_p8 = scmp.ne.s32.totalorder %s4479_s3, %s3829_s23  ;;  %p3833_p9 = scmp.lt.u32.totalorder %s3829_s23, %s4479_s3 }
  0x19   :  { %p3835_p10 = pnand %p3833_p9, %p3830_p8 }
  0x1b   :  { %3838 = shalt.err (!%p3835_p10)
}
  0x1c   :  { %s3839_s29 = scalar_lea.vmem %s4033_s30, 512  ;;  %p3844_p12 = scmp.lt.s32.totalorder %s4033_s30, %s4033_s30 }
  0x1d   :  { %p3840_p11 = scmp.ne.s32.totalorder %s4033_s30, %s3839_s29  ;;  %p3845_p13 = scmp.lt.s32.totalorder %s3839_s29, %s3839_s29 }
  0x1f   :  { %p3846_p0 = por %p3845_p13, %p3844_p12 }
  0x21   :  { %p3847_p1 = pnand %p3846_p0, %p3840_p11 }
  0x23   :  { %3850 = shalt.err (!%p3847_p1)
}
  0x24   :  { %s3975_s1 = smov 256   ;;  %s3976_s28 = smov 16  }
  0x25   :  { %65 = dma.hbm_to_vmem [thread:$0]  %s4479_s3, 512, %s4033_s30, [#allocation9], %s3975_s1, %s3975_s1, %s3976_s28  }
  0x26   :  { %s3977_s11 = smov [#allocation2]   ;;  %s3978_s13 = smov [#allocation7]  }
  0x27   :  { %s23_s12 = sshll.u32 %s3977_s11, 4  ;;  %s47_s14 = sshll.u32 %s3978_s13, 4  ;;  %s24_s12 = int_to_ptr.vmem [resolvable:$true] %s23_s12  ;;  %s4067_s14 = int_to_ptr.vmem [resolvable:$true] %s47_s14 }
  0x28   :  { %s3851_s19 = scalar_lea.hbm %s4476_s0, 512 }
  0x29   :  { %p3852_p2 = scmp.ne.s32.totalorder %s4476_s0, %s3851_s19  ;;  %p3855_p3 = scmp.lt.u32.totalorder %s3851_s19, %s4476_s0 }
  0x2b   :  { %p3857_p4 = pnand %p3855_p3, %p3852_p2 }
  0x2d   :  { %3860 = shalt.err (!%p3857_p4)
}
  0x2e   :  { %s3861_s3 = scalar_lea.vmem %s24_s12, 512  ;;  %p3866_p6 = scmp.lt.s32.totalorder %s24_s12, %s24_s12 }
  0x2f   :  { %p3862_p5 = scmp.ne.s32.totalorder %s24_s12, %s3861_s3  ;;  %p3867_p7 = scmp.lt.s32.totalorder %s3861_s3, %s3861_s3 }
  0x31   :  { %p3868_p8 = por %p3867_p7, %p3866_p6 }
  0x33   :  { %p3869_p9 = pnand %p3868_p8, %p3862_p5 }
  0x35   :  { %3872 = shalt.err (!%p3869_p9)
}
  0x36   :  { %29 = dma.hbm_to_vmem [thread:$0]  %s4476_s0, 512, %s24_s12, [#allocation3], %s3973_s17, %s3973_s17, %s3974_s18  }
  0x37   :  { %s3873_s27 = scalar_lea.hbm %s4478_s2, 128 }
  0x38   :  { %p3874_p10 = scmp.ne.s32.totalorder %s4478_s2, %s3873_s27  ;;  %p3877_p11 = scmp.lt.u32.totalorder %s3873_s27, %s4478_s2 }
  0x3a   :  { %p3879_p12 = pnand %p3877_p11, %p3874_p10 }
  0x3c   :  { %3882 = shalt.err (!%p3879_p12)
}
  0x3d   :  { %s3883_s10 = scalar_lea.vmem %s4067_s14, 128  ;;  %p3888_p0 = scmp.lt.s32.totalorder %s4067_s14, %s4067_s14 }
  0x3e   :  { %p3884_p13 = scmp.ne.s32.totalorder %s4067_s14, %s3883_s10  ;;  %p3889_p1 = scmp.lt.s32.totalorder %s3883_s10, %s3883_s10 }
  0x40   :  { %p3890_p2 = por %p3889_p1, %p3888_p0 }
  0x42   :  { %p3891_p3 = pnand %p3890_p2, %p3884_p13 }
  0x44   :  { %3894 = shalt.err (!%p3891_p3)
}
  0x45   :  { %53 = dma.hbm_to_vmem [thread:$0]  %s4478_s2, 128, %s4067_s14, [#allocation6], %s3973_s17, %s3973_s17, %s3974_s18  }
  0x46   :  { %s3979_s12 = smov [#allocation10]   ;;  %s3895_s19 = scalar_lea.hbm %s4480_s4, 1024 }
  0x47   :  { %s71_s13 = sshll.u32 %s3979_s12, 4  ;;  %p3896_p4 = scmp.ne.s32.totalorder %s4480_s4, %s3895_s19  ;;  %s72_s13 = int_to_ptr.vmem [resolvable:$true] %s71_s13 }
  0x48   :  { %p3899_p5 = scmp.lt.u32.totalorder %s3895_s19, %s4480_s4 }
  0x4a   :  { %p3901_p6 = pnand %p3899_p5, %p3896_p4 }
  0x4c   :  { %3904 = shalt.err (!%p3901_p6)
}
  0x4d   :  { %s3905_s3 = scalar_lea.vmem %s72_s13, 1024  ;;  %p3910_p8 = scmp.lt.s32.totalorder %s72_s13, %s72_s13 }
  0x4e   :  { %p3906_p7 = scmp.ne.s32.totalorder %s72_s13, %s3905_s3  ;;  %p3911_p9 = scmp.lt.s32.totalorder %s3905_s3, %s3905_s3 }
  0x50   :  { %p3912_p10 = por %p3911_p9, %p3910_p8 }
  0x52   :  { %p3913_p11 = pnand %p3912_p10, %p3906_p7 }
  0x54   :  { %3916 = shalt.err (!%p3913_p11)
}
  0x55   :  { %s3980_s2 = smov 128   ;;  %s3981_s18 = smov 8  }
  0x56   :  { %77 = dma.hbm_to_vmem [thread:$0]  %s4480_s4, 1024, %s72_s13, [#allocation9], %s3980_s2, %s3980_s2, %s3981_s18  }
  0x57   :  { %s3982_s24 = smov [#allocation11]   ;;  %s3917_s29 = scalar_lea.hbm %s4482_s6, 1024 }
  0x58   :  { %s85_s25 = sshll.u32 %s3982_s24, 4  ;;  %p3918_p12 = scmp.ne.s32.totalorder %s4482_s6, %s3917_s29  ;;  %s86_s25 = int_to_ptr.vmem [resolvable:$true] %s85_s25 }
  0x59   :  { %p3921_p13 = scmp.lt.u32.totalorder %s3917_s29, %s4482_s6 }
  0x5b   :  { %p3923_p0 = pnand %p3921_p13, %p3918_p12 }
  0x5d   :  { %3926 = shalt.err (!%p3923_p0)
}
  0x5e   :  { %s3927_s0 = scalar_lea.vmem %s86_s25, 1024  ;;  %p3932_p2 = scmp.lt.s32.totalorder %s86_s25, %s86_s25 }
  0x5f   :  { %p3928_p1 = scmp.ne.s32.totalorder %s86_s25, %s3927_s0  ;;  %p3933_p3 = scmp.lt.s32.totalorder %s3927_s0, %s3927_s0 }
  0x61   :  { %p3934_p4 = por %p3933_p3, %p3932_p2 }
  0x63   :  { %p3935_p5 = pnand %p3934_p4, %p3928_p1 }
  0x65   :  { %3938 = shalt.err (!%p3935_p5)
}
  0x66   :  { %91 = dma.hbm_to_vmem [thread:$0]  %s4482_s6, 1024, %s86_s25, [#allocation12], %s3980_s2, %s3980_s2, %s3981_s18  }
  0x67   :  { %3961 = dma.done.wait [#allocation3], 512  }
  0x68   :  { %3962 = vsyncadd [#allocation3], 4294966784 }
  0x69   :  { %3963 = dma.done.wait [#allocation6], 256  }
  0x6a   :  { %3964 = vsyncadd [#allocation6], 4294967040 }
  0x6b   :  { %3965 = dma.done.wait [#allocation9], 1536  }
  0x6c   :  { %3966 = vsyncadd [#allocation9], 4294965760 }
  0x6d   :  { %3967 = dma.done.wait [#allocation12], 1024  }
  0x6e   :  { %3968 = vsyncadd [#allocation12], 4294966272  ;;  %v3983_v0 = vmov 0.0   ;;  %v113_v1 = vld [vmem:[#allocation8 + $0x8] sm:$0xff]  ;;  %v115_v2 = vld [vmem:[#allocation8 + $0x18] sm:$0xff]  ;;  %vm117_vm0 = vcmask 130048  }
  0x6f   :  { %185 = vmatprep.mubr.f32.mxu0 %v3983_v0  ;;  %261 = vmatprep.mubr.f32.mxu1 %v3983_v0  ;;  %v112_v3 = vld [vmem:[#allocation8] sm:$0xff]  ;;  %v3494_v4 = vpack.c.bf16 %v115_v2, %v113_v1  ;;  %v114_v5 = vld [vmem:[#allocation8 + $0x10] sm:$0xff]  ;;  %v269_v9 = vld [vmem:[#allocation2 + $0x8] sm:$0xf]  ;;  %v3984_v25 = vmov 0.0|0.0   ;;  %vm3985_vm1 = vmmov 0  }
  0x70   :  { %v3496_v6 = vpack.c.bf16 %v114_v5, %v112_v3  ;;  %v116_v7 = vld [vmem:[#allocation2] sm:$0xf]  ;;  %v193_v8 = vld [vmem:[#allocation2 + $0x4] sm:$0xf]  ;;  %v345_v10 = vld [vmem:[#allocation2 + $0xc] sm:$0xf] }
  0x71   :  { %3495 = vmatprep.subr.bf16.mxu0 %v3494_v4  ;;  %3499 = vmatprep.subr.bf16.mxu1 %v3494_v4  ;;  %v421_v11 = vld [vmem:[#allocation2 + $0x10] sm:$0xf]  ;;  %v497_v12 = vld [vmem:[#allocation2 + $0x14] sm:$0xf]  ;;  %v725_v14 = vld [vmem:[#allocation10 + $0x8] sm:$0xff]  ;;  %s3986_s6 = smov 32  }
  0x72   :  { %3497 = vmatpush1.bf16.msra.mxu0 %v3496_v6  ;;  %3501 = vmatpush1.bf16.msra.mxu1 %v3496_v6  ;;  %v724_v13 = vld [vmem:[#allocation10] sm:$0xff]  ;;  %v730_v16 = vld [vmem:[#allocation10 + $0x28] sm:$0xff]  ;;  %v726_v21 = vld [vmem:[#allocation10 + $0x10] sm:$0xff]  ;;  %vm742_vm2 = vcmask 261120   ;;  %vm2390_vm3 = vcmask 257024   ;;  %vm2594_vm6 = vcmask 1043456  }
  0x73   :  { %3503 = vmatprep.subr.bf16.mxu0 %v3494_v4  ;;  %3507 = vmatprep.subr.bf16.mxu1 %v3494_v4  ;;  %v729_v15 = vld [vmem:[#allocation10 + $0x20] sm:$0xff]  ;;  %v573_v17 = vld [vmem:[#allocation2 + $0x18] sm:$0xf]  ;;  %v649_v18 = vld [vmem:[#allocation2 + $0x1c] sm:$0xf]  ;;  %v4140_v19 = vpack.c.bf16 %v725_v14, %v724_v13  ;;  %vm2590_vm7 = vcmask 31744  }
  0x74   :  { %v4142_v20 = vpack.c.bf16 %v730_v16, %v729_v15  ;;  %v727_v22 = vld [vmem:[#allocation10 + $0x18] sm:$0xff]  ;;  %v731_v23 = vld [vmem:[#allocation10 + $0x30] sm:$0xff]  ;;  %vm2752_vm9 = vcmask 1041408  }
  0x75   :  { %3088 = vmatmul.mubr.msk.f32.vlgmr.msra.gmra.mrb[0].mxu0 %vm117_vm0, %v116_v7  ;;  %3089 = vmatmul.mubr.msk.f32.vlgmr.msra.gmra.mrb[0].mxu1 %vm117_vm0, %v193_v8  ;;  %v732_v24 = vld [vmem:[#allocation10 + $0x38] sm:$0xff]  ;;  %v4152_v26 = vpack.c.bf16 %v727_v22, %v726_v21  ;;  %v736_v29 = vld [vmem:[#allocation5] sm:$0xf]  ;;  %v739_v30 = vld [vmem:[#allocation5 + $0x4] sm:$0xf] }
  0x76   :  { %3505 = vmatpush1.bf16.msra.mxu0 %v3496_v6  ;;  %3509 = vmatpush1.bf16.msra.mxu1 %v3496_v6  ;;  %v4154_v27 = vpack.c.bf16 %v732_v24, %v731_v23  ;;  %v737_v28 = vld [vmem:[#allocation7] sm:$0xf]  ;;  %v741_v31 = vld [vmem:[#allocation7 + $0x4] sm:$0xf]  ;;  %v4213_v48 = vld [vmem:[%s4481_s5] ss:$0 sm:$0xff] }
  0x77   :  { %337 = vmatprep.mubr.f32.mxu0 %v3983_v0  ;;  %413 = vmatprep.mubr.f32.mxu1 %v3983_v0  ;;  %v4219_v56 = vld [vmem:[%s4481_s5 + $0x1] ss:$0 sm:$0xff] }
  0x78   :  { %3511 = vmatprep.subr.bf16.mxu0 %v3494_v4  ;;  %3515 = vmatprep.subr.bf16.mxu1 %v3494_v4 }
  0x79   :  { %3090 = vmatmul.mubr.msk.f32.vlgmr.msra.gmra.mrb[2].mxu0 %vm117_vm0, %v269_v9  ;;  %3091 = vmatmul.mubr.msk.f32.vlgmr.msra.gmra.mrb[2].mxu1 %vm117_vm0, %v345_v10 }
  0x7a   :  { %3513 = vmatpush1.bf16.msra.mxu0 %v3496_v6  ;;  %3517 = vmatpush1.bf16.msra.mxu1 %v3496_v6 }
  0x7b   :  { %489 = vmatprep.mubr.f32.mxu0 %v3983_v0  ;;  %565 = vmatprep.mubr.f32.mxu1 %v3983_v0 }
  0x7c   :  { %3519 = vmatprep.subr.bf16.mxu0 %v3494_v4  ;;  %3523 = vmatprep.subr.bf16.mxu1 %v3494_v4 }
  0x7d   :  { %3092 = vmatmul.mubr.msk.f32.vlgmr.msra.gmra.mrb[4].mxu0 %vm117_vm0, %v421_v11  ;;  %3093 = vmatmul.mubr.msk.f32.vlgmr.msra.gmra.mrb[4].mxu1 %vm117_vm0, %v497_v12 }
  0x7e   :  { %3521 = vmatpush1.bf16.msra.mxu0 %v3496_v6  ;;  %3525 = vmatpush1.bf16.msra.mxu1 %v3496_v6 }
  0x7f   :  { %641 = vmatprep.mubr.f32.mxu0 %v3983_v0  ;;  %717 = vmatprep.mubr.f32.mxu1 %v3983_v0 }
  0x80   :  { %3526 = vmatprep.subr.bf16.mxu0 %v3984_v25  ;;  %3532 = vmatprep.subr.bf16.mxu1 %v3984_v25 }
  0x81   :  { %3094 = vmatmul.mubr.msk.f32.vlgmr.msra.gmra.mrb[6].mxu0 %vm117_vm0, %v573_v17  ;;  %3095 = vmatmul.mubr.msk.f32.vlgmr.msra.gmra.mrb[6].mxu1 %vm117_vm0, %v649_v18 }
  0x82   :  { %3528 = vmatpush3.bf16.msra.mxu0 %v4140_v19  ;;  %3534 = vmatpush3.bf16.msra.mxu1 %v4142_v20 }
  0x83   :  { %3529 = vmatprep.subr.bf16.mxu0 %v3984_v25  ;;  %3535 = vmatprep.subr.bf16.mxu1 %v3984_v25 }
  0x84   :  { %3262 = vmatprep.mubr.msk.f32.mxu0 %vm3985_vm1, %v3983_v0  ;;  %3273 = vmatprep.mubr.msk.f32.mxu1 %vm3985_vm1, %v3983_v0 }
  0x85   :  { %832 = vrot.lane.b32.xlu1 %v737_v28, %s3986_s6 }
  0x86   :  { %3531 = vmatpush3.bf16.msra.mxu0 %v4152_v26  ;;  %3537 = vmatpush3.bf16.msra.mxu1 %v4154_v27 }
  0x87   :  { %3538 = vmatprep.subr.bf16.mxu0 %v3984_v25  ;;  %3544 = vmatprep.subr.bf16.mxu1 %v3984_v25 }
  0x89   :  { %3263 = vmatmul.mubr.msk.f32.vlgmr.msra.gmra.mrb[8].mxu0 %vm742_vm2, %v736_v29  ;;  %3274 = vmatmul.mubr.msk.f32.vlgmr.msra.gmra.mrb[8].mxu1 %vm742_vm2, %v739_v30 }
  0x8a   :  { %941 = vrot.lane.b32.xlu1 %v741_v31, %s3986_s6  ;;  %3540 = vmatpush3.bf16.msra.mxu0 %v4140_v19 }
  0x8b   :  { %3541 = vmatprep.subr.bf16.mxu0 %v3984_v25  ;;  %3546 = vmatpush3.bf16.msra.mxu1 %v4142_v20 }
  0x8c   :  { %3284 = vmatprep.mubr.msk.f32.mxu0 %vm3985_vm1, %v3983_v0  ;;  %3547 = vmatprep.subr.bf16.mxu1 %v3984_v25 }
  0x8d   :  { %3295 = vmatprep.mubr.msk.f32.mxu1 %vm3985_vm1, %v3983_v0 }
  0x8e   :  { %3543 = vmatpush3.bf16.msra.mxu0 %v4152_v26 }
  0x8f   :  { %3549 = vmatpush3.bf16.msra.mxu1 %v4154_v27  ;;  %3550 = vmatprep.subr.bf16.mxu0 %v3984_v25 }
  0x90   :  { %3556 = vmatprep.subr.bf16.mxu1 %v3984_v25 }
  0xf7   :  { %v833_v9 = vpop.permute.xlu1 %832 }
  0xfc   :  { %v942_v11 = vpop.permute.xlu1 %941 }
 0x148   :  { %v187_v32 = vpop.f32.mrb[0].mxu0  ;;  %v4182_v33 = vpop.f32.mrb[0].mxu1 }
 0x149   :  { %v4184_v34 = vpop.f32.mrb[1].mxu0  ;;  %v4186_v35 = vpop.f32.mrb[1].mxu1 }
 0x14c   :  { %v4188_v36 = vpop.f32.mrb[2].mxu0  ;;  %v4190_v37 = vpop.f32.mrb[2].mxu1 }
 0x14d   :  { %v4192_v38 = vpop.f32.mrb[3].mxu0  ;;  %v4194_v39 = vpop.f32.mrb[3].mxu1 }
 0x150   :  { %v4196_v40 = vpop.f32.mrb[4].mxu0  ;;  %v4198_v41 = vpop.f32.mrb[4].mxu1 }
 0x151   :  { %v4200_v42 = vpop.f32.mrb[5].mxu0  ;;  %v4202_v43 = vpop.f32.mrb[5].mxu1 }
 0x154   :  { %v4204_v44 = vpop.f32.mrb[6].mxu0  ;;  %v4206_v45 = vpop.f32.mrb[6].mxu1 }
 0x155   :  { %v4208_v46 = vpop.f32.mrb[7].mxu0  ;;  %v721_v47 = vpop.f32.mrb[7].mxu1 }
 0x15c   :  { %v812_v49 = vpop.f32.mrb[8].mxu0  ;;  %v921_v50 = vpop.f32.mrb[8].mxu1 }
 0x15d   :  { %v816_v51 = vadd.f32 %v812_v49, %v187_v32  ;;  %v925_v52 = vadd.f32 %v921_v50, %v721_v47  ;;  %v3264_v53 = vpop.f32.mrb[9].mxu0  ;;  %v3275_v54 = vpop.f32.mrb[9].mxu1 }
 0x15f   :  { %v823_v55 = vadd.f32 %v4213_v48, %v816_v51  ;;  %v932_v57 = vadd.f32 %v4219_v56, %v925_v52 }
 0x161   :  { %3669 = vtanh.f32 %v823_v55  ;;  %v3099_v60 = vmul.f32 -1.442695, %v823_v55  ;;  %v3102_v61 = vmul.f32 -1.442695, %v932_v57 }
 0x162   :  { %3671 = vtanh.f32 %v932_v57 }
 0x163   :  { %3673 = vpow2.f32 %v3099_v60 }
 0x164   :  { %3675 = vpow2.f32 %v3102_v61 }
 0x16b   :  { %v3670_v58 = vpop.eup %3669 }
 0x16c   :  { %837 = vrot.lane.b32.xlu0 %v3670_v58, %s3973_s17  ;;  %v3672_v59 = vpop.eup %3671 }
 0x16d   :  { %v3674_v62 = vpop.eup %3673 }
 0x16e   :  { %v827_v63 = vadd.f32 1.0, %v3674_v62  ;;  %v3676_v1 = vpop.eup %3675 }
 0x16f   :  { %v936_v2 = vadd.f32 1.0, %v3676_v1 }
 0x170   :  { %946 = vrot.lane.b32.xlu0 %v3672_v59, %s3973_s17  ;;  %3677 = vrcp.f32 %v827_v63 }
 0x171   :  { %3679 = vrcp.f32 %v936_v2 }
 0x17a   :  { %v3678_v3 = vpop.eup %3677 }
 0x17b   :  { %v3680_v6 = vpop.eup %3679  ;;  %v835_v10 = vmul.f32 %v3678_v3, %v833_v9 }
 0x17c   :  { %v944_v14 = vmul.f32 %v3680_v6, %v942_v11 }
 0x1de   :  { %v838_v4 = vpop.permute.xlu0 %837 }
 0x1df   :  { %v840_v5 = vmul.f32 %v3678_v3, %v838_v4 }
 0x1e1   :  { %842 = vrot.lane.b32.xlu0 %v840_v5, %s3986_s6 }
 0x1e2   :  { %v947_v7 = vpop.permute.xlu0 %946 }
 0x1e3   :  { %v949_v8 = vmul.f32 %v3680_v6, %v947_v7 }
 0x1e5   :  { %951 = vrot.lane.b32.xlu1 %v949_v8, %s3986_s6 }
 0x253   :  { %v843_v12 = vpop.permute.xlu0 %842 }
 0x254   :  { %v845_v13 = vadd.f32 %v843_v12, %v835_v10 }
 0x256   :  { %3681 = vtanh.f32 %v845_v13 }
 0x257   :  { %v952_v15 = vpop.permute.xlu1 %951 }
 0x258   :  { %v954_v16 = vadd.f32 %v952_v15, %v944_v14 }
 0x25a   :  { %3683 = vtanh.f32 %v954_v16 }
 0x260   :  { %v3682_v17 = vpop.eup %3681 }
 0x261   :  { %848 = vrot.lane.b32.xlu0 %v3682_v17, %s3973_s17 }
 0x264   :  { %v3684_v18 = vpop.eup %3683 }
 0x265   :  { %957 = vrot.lane.b32.xlu1 %v3684_v18, %s3973_s17 }
 0x2d3   :  { %v849_v21 = vpop.permute.xlu0 %848 }
 0x2d4   :  { %v851_v22 = vmul.f32 %v3678_v3, %v849_v21 }
 0x2d6   :  { %962 = vrot.lane.b32.xlu0 %v851_v22, %s3986_s6 }
 0x2d7   :  { %v958_v23 = vpop.permute.xlu1 %957 }
 0x2d8   :  { %v960_v24 = vmul.f32 %v3680_v6, %v958_v23 }
 0x2da   :  { %1063 = vrot.lane.b32.xlu1 %v960_v24, %s3986_s6 }
 0x348   :  { %v963_v28 = vpop.permute.xlu0 %962 }
 0x349   :  { %3285 = vmatmul.mubr.msk.f32.vlgmr.msra.gmra.mrb[10].mxu0 %vm742_vm2, %v963_v28 }
 0x34a   :  { %3552 = vmatpush3.bf16.msra.mxu0 %v4140_v19  ;;  %3306 = vmatprep.mubr.msk.f32.mxu0 %vm3985_vm1, %v3983_v0 }
 0x34b   :  { %3553 = vmatprep.subr.bf16.mxu0 %v3984_v25 }
 0x34c   :  { %v1064_v29 = vpop.permute.xlu1 %1063 }
 0x34d   :  { %3296 = vmatmul.mubr.msk.f32.vlgmr.msra.gmra.mrb[10].mxu1 %vm742_vm2, %v1064_v29 }
 0x34e   :  { %3555 = vmatpush3.bf16.msra.mxu0 %v4152_v26  ;;  %3558 = vmatpush3.bf16.msra.mxu1 %v4142_v20 }
 0x34f   :  { %3559 = vmatprep.subr.bf16.mxu1 %v3984_v25  ;;  %3317 = vmatprep.mubr.msk.f32.mxu1 %vm3985_vm1, %v3983_v0 }
 0x350   :  { %3562 = vmatprep.subr.bf16.mxu0 %v3984_v25 }
 0x352   :  { %3561 = vmatpush3.bf16.msra.mxu1 %v4154_v27 }
 0x353   :  { %3568 = vmatprep.subr.bf16.mxu1 %v3984_v25 }
 0x41c   :  { %v1032_v30 = vpop.f32.mrb[10].mxu0 }
 0x41d   :  { %v1036_v31 = vadd.f32 %v1032_v30, %v4182_v33  ;;  %v3286_v32 = vpop.f32.mrb[11].mxu0 }
 0x41f   :  { %v1037_v47 = vadd.f32 %v4213_v48, %v1036_v31 }
 0x420   :  { %v1133_v49 = vpop.f32.mrb[10].mxu1 }
 0x421   :  { %3685 = vtanh.f32 %v1037_v47  ;;  %v1137_v50 = vadd.f32 %v1133_v49, %v4208_v46  ;;  %v3297_v51 = vpop.f32.mrb[11].mxu1  ;;  %v3104_v55 = vmul.f32 -1.442695, %v1037_v47 }
 0x423   :  { %v1138_v52 = vadd.f32 %v4219_v56, %v1137_v50 }
 0x425   :  { %3687 = vtanh.f32 %v1138_v52  ;;  %v3106_v33 = vmul.f32 -1.442695, %v1138_v52 }
 0x426   :  { %3689 = vpow2.f32 %v3104_v55 }
 0x427   :  { %3691 = vpow2.f32 %v3106_v33 }
 0x42b   :  { %v3686_v53 = vpop.eup %3685 }
 0x42c   :  { %1047 = vrot.lane.b32.xlu0 %v3686_v53, %s3973_s17 }
 0x42f   :  { %v3688_v54 = vpop.eup %3687 }
 0x430   :  { %1148 = vrot.lane.b32.xlu1 %v3688_v54, %s3973_s17  ;;  %v3690_v57 = vpop.eup %3689 }
 0x431   :  { %v1041_v58 = vadd.f32 1.0, %v3690_v57  ;;  %v3692_v59 = vpop.eup %3691 }
 0x432   :  { %v1142_v60 = vadd.f32 1.0, %v3692_v59 }
 0x433   :  { %3693 = vrcp.f32 %v1041_v58 }
 0x434   :  { %3695 = vrcp.f32 %v1142_v60 }
 0x43d   :  { %v3694_v46 = vpop.eup %3693 }
 0x43e   :  { %v3696_v63 = vpop.eup %3695  ;;  %v1045_v3 = vmul.f32 %v3694_v46, %v845_v13 }
 0x43f   :  { %v1146_v6 = vmul.f32 %v3696_v63, %v954_v16 }
 0x49e   :  { %v1048_v61 = vpop.permute.xlu0 %1047 }
 0x49f   :  { %v1050_v62 = vmul.f32 %v3694_v46, %v1048_v61 }
 0x4a1   :  { %1052 = vrot.lane.b32.xlu0 %v1050_v62, %s3986_s6 }
 0x4a2   :  { %v1149_v1 = vpop.permute.xlu1 %1148 }
 0x4a3   :  { %v1151_v2 = vmul.f32 %v3696_v63, %v1149_v1 }
 0x4a5   :  { %1153 = vrot.lane.b32.xlu1 %v1151_v2, %s3986_s6 }
 0x513   :  { %v1053_v4 = vpop.permute.xlu0 %1052 }
 0x514   :  { %v1055_v5 = vadd.f32 %v1053_v4, %v1045_v3 }
 0x516   :  { %3697 = vtanh.f32 %v1055_v5 }
 0x517   :  { %v1154_v7 = vpop.permute.xlu1 %1153 }
 0x518   :  { %v1156_v8 = vadd.f32 %v1154_v7, %v1146_v6 }
 0x51a   :  { %3699 = vtanh.f32 %v1156_v8 }
 0x520   :  { %v3698_v9 = vpop.eup %3697 }
 0x521   :  { %1058 = vrot.lane.b32.xlu0 %v3698_v9, %s3973_s17 }
 0x524   :  { %v3700_v10 = vpop.eup %3699 }
 0x525   :  { %1159 = vrot.lane.b32.xlu1 %v3700_v10, %s3973_s17 }
 0x593   :  { %v1059_v11 = vpop.permute.xlu0 %1058 }
 0x594   :  { %v1061_v12 = vmul.f32 %v3694_v46, %v1059_v11 }
 0x596   :  { %1164 = vrot.lane.b32.xlu0 %v1061_v12, %s3986_s6 }
 0x597   :  { %v1160_v14 = vpop.permute.xlu1 %1159 }
 0x598   :  { %v1162_v15 = vmul.f32 %v3696_v63, %v1160_v14 }
 0x59a   :  { %1265 = vrot.lane.b32.xlu1 %v1162_v15, %s3986_s6 }
 0x608   :  { %v1165_v13 = vpop.permute.xlu0 %1164 }
 0x609   :  { %3307 = vmatmul.mubr.msk.f32.vlgmr.msra.gmra.mrb[12].mxu0 %vm742_vm2, %v1165_v13 }
 0x60a   :  { %3564 = vmatpush3.bf16.msra.mxu0 %v4140_v19  ;;  %3328 = vmatprep.mubr.msk.f32.mxu0 %vm3985_vm1, %v3983_v0 }
 0x60b   :  { %3565 = vmatprep.subr.bf16.mxu0 %v3984_v25 }
 0x60c   :  { %v1266_v16 = vpop.permute.xlu1 %1265 }
 0x60d   :  { %3318 = vmatmul.mubr.msk.f32.vlgmr.msra.gmra.mrb[12].mxu1 %vm742_vm2, %v1266_v16 }
 0x60e   :  { %3567 = vmatpush3.bf16.msra.mxu0 %v4152_v26  ;;  %3570 = vmatpush3.bf16.msra.mxu1 %v4142_v20 }
 0x60f   :  { %3571 = vmatprep.subr.bf16.mxu1 %v3984_v25  ;;  %3339 = vmatprep.mubr.msk.f32.mxu1 %vm3985_vm1, %v3983_v0 }
 0x610   :  { %3574 = vmatprep.subr.bf16.mxu0 %v3984_v25 }
 0x612   :  { %3573 = vmatpush3.bf16.msra.mxu1 %v4154_v27 }
 0x613   :  { %3580 = vmatprep.subr.bf16.mxu1 %v3984_v25 }
 0x6dc   :  { %v1234_v17 = vpop.f32.mrb[12].mxu0 }
 0x6dd   :  { %v1238_v18 = vadd.f32 %v1234_v17, %v4188_v36  ;;  %v3308_v21 = vpop.f32.mrb[13].mxu0 }
 0x6df   :  { %v1239_v22 = vadd.f32 %v4213_v48, %v1238_v18 }
 0x6e0   :  { %v1335_v23 = vpop.f32.mrb[12].mxu1 }
 0x6e1   :  { %3701 = vtanh.f32 %v1239_v22  ;;  %v1339_v24 = vadd.f32 %v1335_v23, %v4202_v43  ;;  %v3319_v28 = vpop.f32.mrb[13].mxu1  ;;  %v3108_v32 = vmul.f32 -1.442695, %v1239_v22 }
 0x6e3   :  { %v1340_v29 = vadd.f32 %v4219_v56, %v1339_v24 }
 0x6e5   :  { %3703 = vtanh.f32 %v1340_v29  ;;  %v3110_v36 = vmul.f32 -1.442695, %v1340_v29 }
 0x6e6   :  { %3705 = vpow2.f32 %v3108_v32 }
 0x6e7   :  { %3707 = vpow2.f32 %v3110_v36 }
 0x6eb   :  { %v3702_v30 = vpop.eup %3701 }
 0x6ec   :  { %1249 = vrot.lane.b32.xlu0 %v3702_v30, %s3973_s17 }
 0x6ef   :  { %v3704_v31 = vpop.eup %3703 }
 0x6f0   :  { %1350 = vrot.lane.b32.xlu1 %v3704_v31, %s3973_s17  ;;  %v3706_v47 = vpop.eup %3705 }
 0x6f1   :  { %v1243_v49 = vadd.f32 1.0, %v3706_v47  ;;  %v3708_v50 = vpop.eup %3707 }
 0x6f2   :  { %v1344_v51 = vadd.f32 1.0, %v3708_v50 }
 0x6f3   :  { %3709 = vrcp.f32 %v1243_v49 }
 0x6f4   :  { %3711 = vrcp.f32 %v1344_v51 }
 0x6fd   :  { %v3710_v43 = vpop.eup %3709 }
 0x6fe   :  { %v3712_v54 = vpop.eup %3711  ;;  %v1247_v57 = vmul.f32 %v3710_v43, %v1055_v5 }
 0x6ff   :  { %v1348_v60 = vmul.f32 %v3712_v54, %v1156_v8 }
 0x75e   :  { %v1250_v52 = vpop.permute.xlu0 %1249 }
 0x75f   :  { %v1252_v53 = vmul.f32 %v3710_v43, %v1250_v52 }
 0x761   :  { %1254 = vrot.lane.b32.xlu0 %v1252_v53, %s3986_s6 }
 0x762   :  { %v1351_v55 = vpop.permute.xlu1 %1350 }
 0x763   :  { %v1353_v33 = vmul.f32 %v3712_v54, %v1351_v55 }
 0x765   :  { %1355 = vrot.lane.b32.xlu1 %v1353_v33, %s3986_s6 }
 0x7d3   :  { %v1255_v58 = vpop.permute.xlu0 %1254 }
 0x7d4   :  { %v1257_v59 = vadd.f32 %v1255_v58, %v1247_v57 }
 0x7d6   :  { %3713 = vtanh.f32 %v1257_v59 }
 0x7d7   :  { %v1356_v46 = vpop.permute.xlu1 %1355 }
 0x7d8   :  { %v1358_v61 = vadd.f32 %v1356_v46, %v1348_v60 }
 0x7da   :  { %3715 = vtanh.f32 %v1358_v61 }
 0x7e0   :  { %v3714_v62 = vpop.eup %3713 }
 0x7e1   :  { %1260 = vrot.lane.b32.xlu0 %v3714_v62, %s3973_s17 }
 0x7e4   :  { %v3716_v63 = vpop.eup %3715 }
 0x7e5   :  { %1361 = vrot.lane.b32.xlu1 %v3716_v63, %s3973_s17 }
 0x853   :  { %v1261_v1 = vpop.permute.xlu0 %1260 }
 0x854   :  { %v1263_v2 = vmul.f32 %v3710_v43, %v1261_v1 }
 0x856   :  { %1366 = vrot.lane.b32.xlu0 %v1263_v2, %s3986_s6 }
 0x857   :  { %v1362_v3 = vpop.permute.xlu1 %1361 }
 0x858   :  { %v1364_v4 = vmul.f32 %v3712_v54, %v1362_v3 }
 0x85a   :  { %1467 = vrot.lane.b32.xlu1 %v1364_v4, %s3986_s6 }
 0x8c8   :  { %v1367_v5 = vpop.permute.xlu0 %1366 }
 0x8c9   :  { %3329 = vmatmul.mubr.msk.f32.vlgmr.msra.gmra.mrb[14].mxu0 %vm742_vm2, %v1367_v5 }
 0x8ca   :  { %3576 = vmatpush3.bf16.msra.mxu0 %v4140_v19  ;;  %3350 = vmatprep.mubr.msk.f32.mxu0 %vm3985_vm1, %v3983_v0 }
 0x8cb   :  { %3577 = vmatprep.subr.bf16.mxu0 %v3984_v25 }
 0x8cc   :  { %v1468_v6 = vpop.permute.xlu1 %1467 }
 0x8cd   :  { %3340 = vmatmul.mubr.msk.f32.vlgmr.msra.gmra.mrb[14].mxu1 %vm742_vm2, %v1468_v6 }
 0x8ce   :  { %3579 = vmatpush3.bf16.msra.mxu0 %v4152_v26  ;;  %3582 = vmatpush3.bf16.msra.mxu1 %v4142_v20 }
 0x8cf   :  { %3583 = vmatprep.subr.bf16.mxu1 %v3984_v25  ;;  %3361 = vmatprep.mubr.msk.f32.mxu1 %vm3985_vm1, %v3983_v0 }
 0x8d0   :  { %3586 = vmatprep.subr.bf16.mxu0 %v3984_v25 }
 0x8d2   :  { %3585 = vmatpush3.bf16.msra.mxu1 %v4154_v27 }
 0x8d3   :  { %3592 = vmatprep.subr.bf16.mxu1 %v3984_v25 }
 0x99c   :  { %v1436_v7 = vpop.f32.mrb[14].mxu0 }
 0x99d   :  { %v1440_v8 = vadd.f32 %v1436_v7, %v4190_v37  ;;  %v3330_v9 = vpop.f32.mrb[15].mxu0 }
 0x99f   :  { %v1441_v10 = vadd.f32 %v4213_v48, %v1440_v8 }
 0x9a0   :  { %v1537_v11 = vpop.f32.mrb[14].mxu1 }
 0x9a1   :  { %3717 = vtanh.f32 %v1441_v10  ;;  %v1541_v12 = vadd.f32 %v1537_v11, %v4200_v42  ;;  %v3341_v14 = vpop.f32.mrb[15].mxu1  ;;  %v3112_v17 = vmul.f32 -1.442695, %v1441_v10 }
 0x9a3   :  { %v1542_v15 = vadd.f32 %v4219_v56, %v1541_v12 }
 0x9a5   :  { %3719 = vtanh.f32 %v1542_v15  ;;  %v3114_v37 = vmul.f32 -1.442695, %v1542_v15 }
 0x9a6   :  { %3721 = vpow2.f32 %v3112_v17 }
 0x9a7   :  { %3723 = vpow2.f32 %v3114_v37 }
 0x9ab   :  { %v3718_v13 = vpop.eup %3717 }
 0x9ac   :  { %1451 = vrot.lane.b32.xlu0 %v3718_v13, %s3973_s17 }
 0x9af   :  { %v3720_v16 = vpop.eup %3719 }
 0x9b0   :  { %1552 = vrot.lane.b32.xlu1 %v3720_v16, %s3973_s17  ;;  %v3722_v18 = vpop.eup %3721 }
 0x9b1   :  { %v1445_v21 = vadd.f32 1.0, %v3722_v18  ;;  %v3724_v22 = vpop.eup %3723 }
 0x9b2   :  { %v1546_v23 = vadd.f32 1.0, %v3724_v22 }
 0x9b3   :  { %3725 = vrcp.f32 %v1445_v21 }
 0x9b4   :  { %3727 = vrcp.f32 %v1546_v23 }
 0x9bd   :  { %v3726_v42 = vpop.eup %3725 }
 0x9be   :  { %v3728_v29 = vpop.eup %3727  ;;  %v1449_v32 = vmul.f32 %v3726_v42, %v1257_v59 }
 0x9bf   :  { %v1550_v49 = vmul.f32 %v3728_v29, %v1358_v61 }
 0xa1e   :  { %v1452_v24 = vpop.permute.xlu0 %1451 }
 0xa1f   :  { %v1454_v28 = vmul.f32 %v3726_v42, %v1452_v24 }
 0xa21   :  { %1456 = vrot.lane.b32.xlu0 %v1454_v28, %s3986_s6 }
 0xa22   :  { %v1553_v30 = vpop.permute.xlu1 %1552 }
 0xa23   :  { %v1555_v31 = vmul.f32 %v3728_v29, %v1553_v30 }
 0xa25   :  { %1557 = vrot.lane.b32.xlu1 %v1555_v31, %s3986_s6 }
 0xa93   :  { %v1457_v36 = vpop.permute.xlu0 %1456 }
 0xa94   :  { %v1459_v47 = vadd.f32 %v1457_v36, %v1449_v32 }
 0xa96   :  { %3729 = vtanh.f32 %v1459_v47 }
 0xa97   :  { %v1558_v50 = vpop.permute.xlu1 %1557 }
 0xa98   :  { %v1560_v51 = vadd.f32 %v1558_v50, %v1550_v49 }
 0xa9a   :  { %3731 = vtanh.f32 %v1560_v51 }
 0xaa0   :  { %v3730_v43 = vpop.eup %3729 }
 0xaa1   :  { %1462 = vrot.lane.b32.xlu0 %v3730_v43, %s3973_s17 }
 0xaa4   :  { %v3732_v52 = vpop.eup %3731 }
 0xaa5   :  { %1563 = vrot.lane.b32.xlu1 %v3732_v52, %s3973_s17 }
 0xb13   :  { %v1463_v53 = vpop.permute.xlu0 %1462 }
 0xb14   :  { %v1465_v54 = vmul.f32 %v3726_v42, %v1463_v53 }
 0xb16   :  { %1568 = vrot.lane.b32.xlu0 %v1465_v54, %s3986_s6 }
 0xb17   :  { %v1564_v55 = vpop.permute.xlu1 %1563 }
 0xb18   :  { %v1566_v33 = vmul.f32 %v3728_v29, %v1564_v55 }
 0xb1a   :  { %1669 = vrot.lane.b32.xlu1 %v1566_v33, %s3986_s6 }
 0xb88   :  { %v1569_v57 = vpop.permute.xlu0 %1568 }
 0xb89   :  { %3351 = vmatmul.mubr.msk.f32.vlgmr.msra.gmra.mrb[16].mxu0 %vm742_vm2, %v1569_v57 }
 0xb8a   :  { %3588 = vmatpush3.bf16.msra.mxu0 %v4140_v19  ;;  %3372 = vmatprep.mubr.msk.f32.mxu0 %vm3985_vm1, %v3983_v0 }
 0xb8b   :  { %3589 = vmatprep.subr.bf16.mxu0 %v3984_v25 }
 0xb8c   :  { %v1670_v58 = vpop.permute.xlu1 %1669 }
 0xb8d   :  { %3362 = vmatmul.mubr.msk.f32.vlgmr.msra.gmra.mrb[16].mxu1 %vm742_vm2, %v1670_v58 }
 0xb8e   :  { %3591 = vmatpush3.bf16.msra.mxu0 %v4152_v26  ;;  %3594 = vmatpush3.bf16.msra.mxu1 %v4142_v20 }
 0xb8f   :  { %3595 = vmatprep.subr.bf16.mxu1 %v3984_v25  ;;  %3383 = vmatprep.mubr.msk.f32.mxu1 %vm3985_vm1, %v3983_v0 }
 0xb90   :  { %3598 = vmatprep.subr.bf16.mxu0 %v3984_v25 }
 0xb92   :  { %3597 = vmatpush3.bf16.msra.mxu1 %v4154_v27 }
 0xb93   :  { %3604 = vmatprep.subr.bf16.mxu1 %v3984_v25 }
 0xc5c   :  { %v1638_v59 = vpop.f32.mrb[16].mxu0 }
 0xc5d   :  { %v1642_v60 = vadd.f32 %v1638_v59, %v4196_v40  ;;  %v3352_v46 = vpop.f32.mrb[17].mxu0 }
 0xc5f   :  { %v1643_v61 = vadd.f32 %v4213_v48, %v1642_v60 }
 0xc60   :  { %v1739_v62 = vpop.f32.mrb[16].mxu1 }
 0xc61   :  { %3733 = vtanh.f32 %v1643_v61  ;;  %v1743_v63 = vadd.f32 %v1739_v62, %v4194_v39  ;;  %v3363_v1 = vpop.f32.mrb[17].mxu1  ;;  %v3116_v5 = vmul.f32 -1.442695, %v1643_v61 }
 0xc63   :  { %v1744_v2 = vadd.f32 %v4219_v56, %v1743_v63 }
 0xc65   :  { %3735 = vtanh.f32 %v1744_v2  ;;  %v3118_v40 = vmul.f32 -1.442695, %v1744_v2 }
 0xc66   :  { %3737 = vpow2.f32 %v3116_v5 }
 0xc67   :  { %3739 = vpow2.f32 %v3118_v40 }
 0xc6b   :  { %v3734_v3 = vpop.eup %3733 }
 0xc6c   :  { %1653 = vrot.lane.b32.xlu0 %v3734_v3, %s3973_s17 }
 0xc6f   :  { %v3736_v4 = vpop.eup %3735 }
 0xc70   :  { %1754 = vrot.lane.b32.xlu1 %v3736_v4, %s3973_s17  ;;  %v3738_v6 = vpop.eup %3737 }
 0xc71   :  { %v1647_v7 = vadd.f32 1.0, %v3738_v6  ;;  %v3740_v8 = vpop.eup %3739 }
 0xc72   :  { %v1748_v9 = vadd.f32 1.0, %v3740_v8 }
 0xc73   :  { %3741 = vrcp.f32 %v1647_v7 }
 0xc74   :  { %3743 = vrcp.f32 %v1748_v9 }
 0xc7d   :  { %v3742_v39 = vpop.eup %3741 }
 0xc7e   :  { %v3744_v12 = vpop.eup %3743  ;;  %v1651_v13 = vmul.f32 %v3742_v39, %v1459_v47 }
 0xc7f   :  { %v1752_v37 = vmul.f32 %v3744_v12, %v1560_v51 }
 0xcde   :  { %v1654_v10 = vpop.permute.xlu0 %1653 }
 0xcdf   :  { %v1656_v11 = vmul.f32 %v3742_v39, %v1654_v10 }
 0xce1   :  { %1658 = vrot.lane.b32.xlu0 %v1656_v11, %s3986_s6 }
 0xce2   :  { %v1755_v14 = vpop.permute.xlu1 %1754 }
 0xce3   :  { %v1757_v15 = vmul.f32 %v3744_v12, %v1755_v14 }
 0xce5   :  { %1759 = vrot.lane.b32.xlu1 %v1757_v15, %s3986_s6 }
 0xd53   :  { %v1659_v16 = vpop.permute.xlu0 %1658 }
 0xd54   :  { %v1661_v17 = vadd.f32 %v1659_v16, %v1651_v13 }
 0xd56   :  { %3745 = vtanh.f32 %v1661_v17 }
 0xd57   :  { %v1760_v18 = vpop.permute.xlu1 %1759 }
 0xd58   :  { %v1762_v21 = vadd.f32 %v1760_v18, %v1752_v37 }
 0xd5a   :  { %3747 = vtanh.f32 %v1762_v21 }
 0xd60   :  { %v3746_v22 = vpop.eup %3745 }
 0xd61   :  { %1664 = vrot.lane.b32.xlu0 %v3746_v22, %s3973_s17 }
 0xd64   :  { %v3748_v23 = vpop.eup %3747 }
 0xd65   :  { %1765 = vrot.lane.b32.xlu1 %v3748_v23, %s3973_s17 }
 0xdd3   :  { %v1665_v42 = vpop.permute.xlu0 %1664 }
 0xdd4   :  { %v1667_v24 = vmul.f32 %v3742_v39, %v1665_v42 }
 0xdd6   :  { %1770 = vrot.lane.b32.xlu0 %v1667_v24, %s3986_s6 }
 0xdd7   :  { %v1766_v28 = vpop.permute.xlu1 %1765 }
 0xdd8   :  { %v1768_v29 = vmul.f32 %v3744_v12, %v1766_v28 }
 0xdda   :  { %1871 = vrot.lane.b32.xlu1 %v1768_v29, %s3986_s6 }
 0xe48   :  { %v1771_v30 = vpop.permute.xlu0 %1770 }
 0xe49   :  { %3373 = vmatmul.mubr.msk.f32.vlgmr.msra.gmra.mrb[18].mxu0 %vm742_vm2, %v1771_v30 }
 0xe4a   :  { %3600 = vmatpush3.bf16.msra.mxu0 %v4140_v19  ;;  %3394 = vmatprep.mubr.msk.f32.mxu0 %vm3985_vm1, %v3983_v0 }
 0xe4b   :  { %3601 = vmatprep.subr.bf16.mxu0 %v3984_v25 }
 0xe4c   :  { %v1872_v31 = vpop.permute.xlu1 %1871 }
 0xe4d   :  { %3384 = vmatmul.mubr.msk.f32.vlgmr.msra.gmra.mrb[18].mxu1 %vm742_vm2, %v1872_v31 }
 0xe4e   :  { %3603 = vmatpush3.bf16.msra.mxu0 %v4152_v26  ;;  %3606 = vmatpush3.bf16.msra.mxu1 %v4142_v20 }
 0xe4f   :  { %3607 = vmatprep.subr.bf16.mxu1 %v3984_v25  ;;  %3405 = vmatprep.mubr.msk.f32.mxu1 %vm3985_vm1, %v3983_v0 }
 0xe50   :  { %3610 = vmatprep.subr.bf16.mxu0 %v3984_v25 }
 0xe52   :  { %3609 = vmatpush3.bf16.msra.mxu1 %v4154_v27 }
 0xe53   :  { %3616 = vmatprep.subr.bf16.mxu1 %v3984_v25 }
 0xf1c   :  { %v1840_v32 = vpop.f32.mrb[18].mxu0 }
 0xf1d   :  { %v1844_v36 = vadd.f32 %v1840_v32, %v4198_v41  ;;  %v3374_v47 = vpop.f32.mrb[19].mxu0 }
 0xf1f   :  { %v1845_v49 = vadd.f32 %v4213_v48, %v1844_v36 }
 0xf20   :  { %v1941_v50 = vpop.f32.mrb[18].mxu1 }
 0xf21   :  { %3749 = vtanh.f32 %v1845_v49  ;;  %v1945_v51 = vadd.f32 %v1941_v50, %v4192_v38  ;;  %v3385_v43 = vpop.f32.mrb[19].mxu1  ;;  %v3120_v55 = vmul.f32 -1.442695, %v1845_v49 }
 0xf23   :  { %v1946_v52 = vadd.f32 %v4219_v56, %v1945_v51 }
 0xf25   :  { %3751 = vtanh.f32 %v1946_v52  ;;  %v3122_v41 = vmul.f32 -1.442695, %v1946_v52 }
 0xf26   :  { %3753 = vpow2.f32 %v3120_v55 }
 0xf27   :  { %3755 = vpow2.f32 %v3122_v41 }
 0xf2b   :  { %v3750_v53 = vpop.eup %3749 }
 0xf2c   :  { %1855 = vrot.lane.b32.xlu0 %v3750_v53, %s3973_s17 }
 0xf2f   :  { %v3752_v54 = vpop.eup %3751 }
 0xf30   :  { %1956 = vrot.lane.b32.xlu1 %v3752_v54, %s3973_s17  ;;  %v3754_v33 = vpop.eup %3753 }
 0xf31   :  { %v1849_v57 = vadd.f32 1.0, %v3754_v33  ;;  %v3756_v58 = vpop.eup %3755 }
 0xf32   :  { %v1950_v59 = vadd.f32 1.0, %v3756_v58 }
 0xf33   :  { %3757 = vrcp.f32 %v1849_v57 }
 0xf34   :  { %3759 = vrcp.f32 %v1950_v59 }
 0xf3d   :  { %v3758_v38 = vpop.eup %3757 }
 0xf3e   :  { %v3760_v61 = vpop.eup %3759  ;;  %v1853_v1 = vmul.f32 %v3758_v38, %v1661_v17 }
 0xf3f   :  { %v1954_v4 = vmul.f32 %v3760_v61, %v1762_v21 }
 0xf9e   :  { %v1856_v60 = vpop.permute.xlu0 %1855 }
 0xf9f   :  { %v1858_v46 = vmul.f32 %v3758_v38, %v1856_v60 }
 0xfa1   :  { %1860 = vrot.lane.b32.xlu0 %v1858_v46, %s3986_s6 }
 0xfa2   :  { %v1957_v62 = vpop.permute.xlu1 %1956 }
 0xfa3   :  { %v1959_v63 = vmul.f32 %v3760_v61, %v1957_v62 }
 0xfa5   :  { %1961 = vrot.lane.b32.xlu1 %v1959_v63, %s3986_s6 }
0x1013   :  { %v1861_v2 = vpop.permute.xlu0 %1860 }
0x1014   :  { %v1863_v3 = vadd.f32 %v1861_v2, %v1853_v1 }
0x1016   :  { %3761 = vtanh.f32 %v1863_v3 }
0x1017   :  { %v1962_v5 = vpop.permute.xlu1 %1961 }
0x1018   :  { %v1964_v40 = vadd.f32 %v1962_v5, %v1954_v4 }
0x101a   :  { %3763 = vtanh.f32 %v1964_v40 }
0x1020   :  { %v3762_v6 = vpop.eup %3761 }
0x1021   :  { %1866 = vrot.lane.b32.xlu0 %v3762_v6, %s3973_s17 }
0x1024   :  { %v3764_v7 = vpop.eup %3763 }
0x1025   :  { %1967 = vrot.lane.b32.xlu1 %v3764_v7, %s3973_s17 }
0x1093   :  { %v1867_v8 = vpop.permute.xlu0 %1866 }
0x1094   :  { %v1869_v9 = vmul.f32 %v3758_v38, %v1867_v8 }
0x1096   :  { %1972 = vrot.lane.b32.xlu0 %v1869_v9, %s3986_s6 }
0x1097   :  { %v1968_v39 = vpop.permute.xlu1 %1967 }
0x1098   :  { %v1970_v10 = vmul.f32 %v3760_v61, %v1968_v39 }
0x109a   :  { %2073 = vrot.lane.b32.xlu1 %v1970_v10, %s3986_s6 }
0x1108   :  { %v1973_v11 = vpop.permute.xlu0 %1972 }
0x1109   :  { %3395 = vmatmul.mubr.msk.f32.vlgmr.msra.gmra.mrb[20].mxu0 %vm742_vm2, %v1973_v11 }
0x110a   :  { %3612 = vmatpush3.bf16.msra.mxu0 %v4140_v19  ;;  %3416 = vmatprep.mubr.msk.f32.mxu0 %vm3985_vm1, %v3983_v0 }
0x110b   :  { %3613 = vmatprep.subr.bf16.mxu0 %v3984_v25 }
0x110c   :  { %v2074_v12 = vpop.permute.xlu1 %2073 }
0x110d   :  { %3406 = vmatmul.mubr.msk.f32.vlgmr.msra.gmra.mrb[20].mxu1 %vm742_vm2, %v2074_v12 }
0x110e   :  { %3615 = vmatpush3.bf16.msra.mxu0 %v4152_v26  ;;  %3618 = vmatpush3.bf16.msra.mxu1 %v4142_v20 }
0x110f   :  { %3619 = vmatprep.subr.bf16.mxu1 %v3984_v25  ;;  %3427 = vmatprep.mubr.msk.f32.mxu1 %vm3985_vm1, %v3983_v0 }
0x1110   :  { %3622 = vmatprep.subr.bf16.mxu0 %v3984_v25 }
0x1112   :  { %3621 = vmatpush3.bf16.msra.mxu1 %v4154_v27 }
0x1113   :  { %3628 = vmatprep.subr.bf16.mxu1 %v3984_v25 }
0x11dc   :  { %v2042_v19 = vpop.f32.mrb[20].mxu0 }
0x11dd   :  { %v2046_v14 = vadd.f32 %v2042_v19, %v4204_v44  ;;  %v3396_v15 = vpop.f32.mrb[21].mxu0 }
0x11df   :  { %v2047_v13 = vadd.f32 %v4213_v48, %v2046_v14 }
0x11e0   :  { %v2143_v26 = vpop.f32.mrb[20].mxu1 }
0x11e1   :  { %3765 = vtanh.f32 %v2047_v13  ;;  %v2147_v20 = vadd.f32 %v2143_v26, %v4186_v35  ;;  %v3407_v16 = vpop.f32.mrb[21].mxu1  ;;  %v3124_v18 = vmul.f32 -1.442695, %v2047_v13 }
0x11e3   :  { %v2148_v17 = vadd.f32 %v4219_v56, %v2147_v20 }
0x11e5   :  { %3767 = vtanh.f32 %v2148_v17  ;;  %v3126_v44 = vmul.f32 -1.442695, %v2148_v17 }
0x11e6   :  { %3769 = vpow2.f32 %v3124_v18 }
0x11e7   :  { %3771 = vpow2.f32 %v3126_v44 }
0x11eb   :  { %v3766_v37 = vpop.eup %3765 }
0x11ec   :  { %2057 = vrot.lane.b32.xlu0 %v3766_v37, %s3973_s17 }
0x11ef   :  { %v3768_v27 = vpop.eup %3767 }
0x11f0   :  { %2158 = vrot.lane.b32.xlu1 %v3768_v27, %s3973_s17  ;;  %v3770_v21 = vpop.eup %3769 }
0x11f1   :  { %v2051_v22 = vadd.f32 1.0, %v3770_v21  ;;  %v3772_v23 = vpop.eup %3771 }
0x11f2   :  { %v2152_v42 = vadd.f32 1.0, %v3772_v23 }
0x11f3   :  { %3773 = vrcp.f32 %v2051_v22 }
0x11f4   :  { %3775 = vrcp.f32 %v2152_v42 }
0x11fd   :  { %v3774_v35 = vpop.eup %3773 }
0x11fe   :  { %v3776_v29 = vpop.eup %3775  ;;  %v2055_v32 = vmul.f32 %v3774_v35, %v1863_v3 }
0x11ff   :  { %v2156_v49 = vmul.f32 %v3776_v29, %v1964_v40 }
0x125e   :  { %v2058_v24 = vpop.permute.xlu0 %2057 }
0x125f   :  { %v2060_v28 = vmul.f32 %v3774_v35, %v2058_v24 }
0x1261   :  { %2062 = vrot.lane.b32.xlu0 %v2060_v28, %s3986_s6 }
0x1262   :  { %v2159_v30 = vpop.permute.xlu1 %2158 }
0x1263   :  { %v2161_v31 = vmul.f32 %v3776_v29, %v2159_v30 }
0x1265   :  { %2163 = vrot.lane.b32.xlu1 %v2161_v31, %s3986_s6 }
0x12d3   :  { %v2063_v36 = vpop.permute.xlu0 %2062 }
0x12d4   :  { %v2065_v47 = vadd.f32 %v2063_v36, %v2055_v32 }
0x12d6   :  { %3777 = vtanh.f32 %v2065_v47 }
0x12d7   :  { %v2164_v50 = vpop.permute.xlu1 %2163 }
0x12d8   :  { %v2166_v51 = vadd.f32 %v2164_v50, %v2156_v49  ;;  %v2424_v49 = vld [vmem:[#allocation11 + $0x8] sm:$0xff]  ;;  %v2427_v50 = vld [vmem:[#allocation11 + $0x20] sm:$0xff] }
0x12da   :  { %3779 = vtanh.f32 %v2166_v51 }
0x12e0   :  { %v3778_v43 = vpop.eup %3777 }
0x12e1   :  { %2068 = vrot.lane.b32.xlu0 %v3778_v43, %s3973_s17 }
0x12e4   :  { %v3780_v52 = vpop.eup %3779 }
0x12e5   :  { %2169 = vrot.lane.b32.xlu1 %v3780_v52, %s3973_s17 }
0x1353   :  { %v2069_v53 = vpop.permute.xlu0 %2068 }
0x1354   :  { %v2071_v54 = vmul.f32 %v3774_v35, %v2069_v53  ;;  %v2428_v53 = vld [vmem:[#allocation11 + $0x28] sm:$0xff] }
0x1356   :  { %2174 = vrot.lane.b32.xlu0 %v2071_v54, %s3986_s6  ;;  %v2425_v54 = vld [vmem:[#allocation11 + $0x10] sm:$0xff] }
0x1357   :  { %v2170_v55 = vpop.permute.xlu1 %2169 }
0x1358   :  { %v2172_v41 = vmul.f32 %v3776_v29, %v2170_v55  ;;  %v2426_v55 = vld [vmem:[#allocation11 + $0x18] sm:$0xff] }
0x135a   :  { %2275 = vrot.lane.b32.xlu1 %v2172_v41, %s3986_s6  ;;  %v3629_v41 = vpack.c.bf16 %v2428_v53, %v2427_v50 }
0x13c8   :  { %v2175_v33 = vpop.permute.xlu0 %2174 }
0x13c9   :  { %3417 = vmatmul.mubr.msk.f32.vlgmr.msra.gmra.mrb[22].mxu0 %vm742_vm2, %v2175_v33  ;;  %v2429_v33 = vld [vmem:[#allocation11 + $0x30] sm:$0xff] }
0x13ca   :  { %3438 = vmatprep.mubr.msk.f32.mxu0 %vm3985_vm1, %v3983_v0 }
0x13cc   :  { %v2276_v57 = vpop.permute.xlu1 %2275 }
0x13cd   :  { %3428 = vmatmul.mubr.msk.f32.vlgmr.msra.gmra.mrb[22].mxu1 %vm742_vm2, %v2276_v57  ;;  %v2430_v57 = vld [vmem:[#allocation11 + $0x38] sm:$0xff] }
0x13ce   :  { %3449 = vmatprep.mubr.msk.f32.mxu1 %vm3985_vm1, %v3983_v0  ;;  %3630 = vmatpush3.bf16.msra.mxu1 %v3629_v41 }
0x13cf   :  { %3631 = vmatprep.subr.bf16.mxu1 %v3984_v25 }
0x149c   :  { %v2244_v58 = vpop.f32.mrb[22].mxu0 }
0x149d   :  { %v2248_v59 = vadd.f32 %v2244_v58, %v4206_v45  ;;  %v3418_v38 = vpop.f32.mrb[23].mxu0 }
0x149e   :  { %v3626_v38 = vpack.c.bf16 %v2426_v55, %v2425_v54 }
0x149f   :  { %v2249_v60 = vadd.f32 %v4213_v48, %v2248_v59 }
0x14a0   :  { %v2345_v46 = vpop.f32.mrb[22].mxu1 }
0x14a1   :  { %3781 = vtanh.f32 %v2249_v60  ;;  %v2349_v61 = vadd.f32 %v2345_v46, %v4184_v34  ;;  %v3429_v62 = vpop.f32.mrb[23].mxu1  ;;  %v3128_v3 = vmul.f32 -1.442695, %v2249_v60  ;;  %v3632_v60 = vpack.c.bf16 %v2430_v57, %v2429_v33 }
0x14a3   :  { %v2350_v63 = vadd.f32 %v4219_v56, %v2349_v61  ;;  %3633 = vmatpush3.bf16.msra.mxu1 %v3632_v60 }
0x14a4   :  { %3457 = vmatprep.subr.mxu1 %v3983_v0 }
0x14a5   :  { %3783 = vtanh.f32 %v2350_v63  ;;  %v3130_v45 = vmul.f32 -1.442695, %v2350_v63 }
0x14a6   :  { %3785 = vpow2.f32 %v3128_v3 }
0x14a7   :  { %3787 = vpow2.f32 %v3130_v45 }
0x14ab   :  { %v3782_v1 = vpop.eup %3781 }
0x14ac   :  { %2259 = vrot.lane.b32.xlu0 %v3782_v1, %s3973_s17 }
0x14af   :  { %v3784_v2 = vpop.eup %3783 }
0x14b0   :  { %2360 = vrot.lane.b32.xlu1 %v3784_v2, %s3973_s17  ;;  %v3786_v4 = vpop.eup %3785 }
0x14b1   :  { %v2253_v48 = vadd.f32 1.0, %v3786_v4  ;;  %v3788_v5 = vpop.eup %3787 }
0x14b2   :  { %v2354_v40 = vadd.f32 1.0, %v3788_v5  ;;  %v2432_v5 = vlaneseq }
0x14b3   :  { %3789 = vrcp.f32 %v2253_v48 }
0x14b4   :  { %3791 = vrcp.f32 %v2354_v40  ;;  %v2433_v40 = vshrl.u32 %v2432_v5, 7 }
0x14bd   :  { %v3790_v34 = vpop.eup %3789 }
0x14be   :  { %v3792_v7 = vpop.eup %3791  ;;  %v2257_v39 = vmul.f32 %v3790_v34, %v2065_v47  ;;  %v2423_v47 = vld [vmem:[#allocation11] sm:$0xff] }
0x14bf   :  { %v2358_v12 = vmul.f32 %v3792_v7, %v2166_v51  ;;  %v4406_v52 = vpack.c.bf16 %v2424_v49, %v2423_v47 }
0x14c1   :  { %3624 = vmatpush3.bf16.msra.mxu0 %v4406_v52 }
0x14c2   :  { %3625 = vmatprep.subr.bf16.mxu0 %v3984_v25 }
0x14c5   :  { %3627 = vmatpush3.bf16.msra.mxu0 %v3626_v38 }
0x14c6   :  { %3452 = vmatprep.subr.mxu0 %v3983_v0 }
0x151e   :  { %v2260_v6 = vpop.permute.xlu0 %2259 }
0x151f   :  { %v2262_v56 = vmul.f32 %v3790_v34, %v2260_v6  ;;  %v4421_v6 = vand.u32 127, %v2432_v5 }
0x1521   :  { %2264 = vrot.lane.b32.xlu0 %v2262_v56, %s3986_s6  ;;  %vm2444_vm8 = vcmp.lt.s32.totalorder %v4421_v6, 10 }
0x1522   :  { %v2361_v8 = vpop.permute.xlu1 %2360 }
0x1523   :  { %v2363_v9 = vmul.f32 %v3792_v7, %v2361_v8 }
0x1525   :  { %2365 = vrot.lane.b32.xlu1 %v2363_v9, %s3986_s6 }
0x1593   :  { %v2265_v10 = vpop.permute.xlu0 %2264 }
0x1594   :  { %v2267_v11 = vadd.f32 %v2265_v10, %v2257_v39 }
0x1596   :  { %3793 = vtanh.f32 %v2267_v11 }
0x1597   :  { %v2366_v19 = vpop.permute.xlu1 %2365 }
0x1598   :  { %v2368_v14 = vadd.f32 %v2366_v19, %v2358_v12  ;;  %v3139_v19 = vld [vmem:[%s4483_s7] ss:$0 sm:$0xff]  ;;  %s3987_s7 = smov [#allocation13]  }
0x1599   :  { %s3076_s23 = sshll.u32 %s3987_s7, 4  ;;  %s3077_s23 = int_to_ptr.vmem [resolvable:$true] %s3076_s23 }
0x159a   :  { %3795 = vtanh.f32 %v2368_v14  ;;  %s3939_s3 = scalar_lea.vmem %s3077_s23, 64  ;;  %p3944_p7 = scmp.lt.s32.totalorder %s3077_s23, %s3077_s23 }
0x159b   :  { %p3940_p6 = scmp.ne.s32.totalorder %s3077_s23, %s3939_s3  ;;  %p3945_p8 = scmp.lt.s32.totalorder %s3939_s3, %s3939_s3 }
0x159d   :  { %p3946_p9 = por %p3945_p8, %p3944_p7 }
0x159f   :  { %p3947_p10 = pnand %p3946_p9, %p3940_p6 }
0x15a0   :  { %v3794_v15 = vpop.eup %3793 }
0x15a1   :  { %2270 = vrot.lane.b32.xlu0 %v3794_v15, %s3973_s17 }
0x15a4   :  { %v3796_v13 = vpop.eup %3795 }
0x15a5   :  { %2371 = vrot.lane.b32.xlu1 %v3796_v13, %s3973_s17  ;;  %2376 = vrot.lane.b32.xlu0 %v2267_v11, %s3973_s17 }
0x15a9   :  { %2381 = vrot.lane.b32.xlu1 %v2368_v14, %s3973_s17 }
0x1613   :  { %v2271_v26 = vpop.permute.xlu0 %2270 }
0x1614   :  { %v2273_v20 = vmul.f32 %v3790_v34, %v2271_v26  ;;  %v2436_v34 = vmul.u32 2, %v2433_v40 }
0x1616   :  { %v2440_v56 = vadd.s32 1, %v2436_v34  ;;  %vm2437_vm5 = vcmp.eq.s32.totalorder %v4421_v6, %v2436_v34 }
0x1617   :  { %v2372_v16 = vpop.permute.xlu1 %2371  ;;  %v2377_v17 = vpop.permute.xlu0 %2376  ;;  %v3131_v8 = vsel %vm2437_vm5, 1.0, %v3983_v0 }
0x1618   :  { %v2379_v37 = vadd.f32 %v2377_v17, %v2273_v20  ;;  %v2374_v27 = vmul.f32 %v3792_v7, %v2372_v16  ;;  %vm2441_vm4 = vcmp.eq.s32.totalorder %v4421_v6, %v2440_v56 }
0x1619   :  { %v3132_v7 = vsel %vm2441_vm4, 1.0, %v3983_v0 }
0x161a   :  { %v2385_v18 = vmul.f32 %v2379_v37, %v2379_v37 }
0x161b   :  { %v2382_v44 = vpop.permute.xlu1 %2381 }
0x161c   :  { %v2384_v21 = vadd.f32 %v2382_v44, %v2374_v27  ;;  %2387 = vrot.lane.b32.xlu0 %v2385_v18, %s3986_s6 }
0x161e   :  { %v2401_v22 = vmul.f32 %v2384_v21, %v2384_v21 }
0x1620   :  { %2403 = vrot.lane.b32.xlu1 %v2401_v22, %s3986_s6 }
0x168e   :  { %v2388_v23 = vpop.permute.xlu0 %2387 }
0x168f   :  { %v2391_v42 = vsel %vm2390_vm3, %v2388_v23, 0.0 }
0x1690   :  { %2392 = vadd.xlane.f32.xlu0 %v2391_v42 }
0x1692   :  { %v2404_v35 = vpop.permute.xlu1 %2403 }
0x1693   :  { %v2406_v24 = vsel %vm2390_vm3, %v2404_v35, 0.0 }
0x1694   :  { %2407 = vadd.xlane.f32.xlu1 %v2406_v24 }
0x171d   :  { %v2393_v28 = vpop.xlane.xlu0 %2392 }
0x171e   :  { %v2394_v29 = vrot.slane %v2393_v28, 4 }
0x1720   :  { %v2395_v30 = vadd.f32 %v2394_v29, %v2393_v28 }
0x1721   :  { %v2408_v31 = vpop.xlane.xlu1 %2407 }
0x1722   :  { %v2396_v32 = vrot.slane %v2395_v30, 2  ;;  %v2409_v36 = vrot.slane %v2408_v31, 4 }
0x1724   :  { %v2410_v51 = vadd.f32 %v2409_v36, %v2408_v31  ;;  %v2397_v43 = vadd.f32 %v2396_v32, %v2395_v30 }
0x1726   :  { %v2411_v58 = vrot.slane %v2410_v51, 2  ;;  %v2398_v59 = vrot.slane %v2397_v43, 1 }
0x1728   :  { %v2399_v46 = vadd.f32 %v2398_v59, %v2397_v43  ;;  %v2412_v61 = vadd.f32 %v2411_v58, %v2410_v51 }
0x172a   :  { %3646 = vpush %v2399_v46  ;;  %v2413_v62 = vrot.slane %v2412_v61, 1 }
0x172c   :  { %v2414_v63 = vadd.f32 %v2413_v62, %v2412_v61 }
0x172e   :  { %3648 = vpush %v2414_v63 }
0x175b   :  { %s3647_s5 = spop %3646 }
0x175f   :  { %s3649_s17 = spop %3648 }
0x1760   :  { %s2416_s19 = sadd.f32 %s3649_s17, %s3647_s5 }
0x1762   :  { %v2417_v1 = vstv %s2416_s19 }
0x1763   :  { %3797 = vrsqrt.f32 %v2417_v1 }
0x176d   :  { %v3798_v2 = vpop.eup %3797 }
0x176e   :  { %3650 = vpush %v3798_v2 }
0x179f   :  { %s3651_s20 = spop %3650 }
0x17a0   :  { %v2420_v3 = vstv %s3651_s20 }
0x17a1   :  { %v2421_v45 = vmul.f32 %v2420_v3, %v2379_v37  ;;  %v2422_v4 = vmul.f32 %v2420_v3, %v2384_v21 }
0x17a3   :  { %2766 = vrot.lane.b32.xlu1 %v2422_v4, %s3986_s6  ;;  %2446 = vrot.lane.b32.xlu0 %v2421_v45, %s3986_s6 }
0x1815   :  { %v2447_v48 = vpop.permute.xlu0 %2446  ;;  %v2767_v12 = vpop.permute.xlu1 %2766 }
0x1816   :  { %3439 = vmatmul.mubr.msk.f32.vlgmr.msra.gmra.mrb[24].mxu0 %vm742_vm2, %v2447_v48  ;;  %3450 = vmatmul.mubr.msk.f32.vlgmr.msra.gmra.mrb[24].mxu1 %vm742_vm2, %v2447_v48 }
0x1817   :  { %3454 = vmatprep.mubr.msk.f32.mxu0 %vm3985_vm1, %v3983_v0  ;;  %3459 = vmatprep.mubr.msk.f32.mxu1 %vm3985_vm1, %v3983_v0 }
0x18e9   :  { %v2516_v9 = vpop.f32.mrb[24].mxu0  ;;  %v2586_v39 = vpop.f32.mrb[24].mxu1 }
0x18ea   :  { %v3440_v10 = vpop.f32.mrb[25].mxu0  ;;  %v3451_v11 = vpop.f32.mrb[25].mxu1  ;;  %3453 = vmatpush3.msk.msra.mxu0 %vm2594_vm6, %v2586_v39  ;;  %3458 = vmatpush3.msk.msra.mxu1 %vm2594_vm6, %v2516_v9 }
0x18eb   :  { %3455 = vmatmul.mubr.msk.f32.vlgmr.msra.gmra.mrb[26].mxu0 %vm2590_vm7, %v3132_v7  ;;  %3460 = vmatmul.mubr.msk.f32.vlgmr.msra.gmra.mrb[26].mxu1 %vm2590_vm7, %v3131_v8 }
0x18ec   :  { %3634 = vmatprep.subr.bf16.mxu0 %v3984_v25  ;;  %3640 = vmatprep.subr.bf16.mxu1 %v3984_v25 }
0x18ed   :  { %3636 = vmatpush3.bf16.msra.mxu0 %v4406_v52  ;;  %3642 = vmatpush3.bf16.msra.mxu1 %v3629_v41 }
0x18ee   :  { %3637 = vmatprep.subr.bf16.mxu0 %v3984_v25  ;;  %3643 = vmatprep.subr.bf16.mxu1 %v3984_v25 }
0x18ef   :  { %3470 = vmatprep.mubr.msk.f32.mxu0 %vm3985_vm1, %v3983_v0  ;;  %3481 = vmatprep.mubr.msk.f32.mxu1 %vm3985_vm1, %v3983_v0 }
0x18f1   :  { %3639 = vmatpush3.bf16.msra.mxu0 %v3626_v38  ;;  %3645 = vmatpush3.bf16.msra.mxu1 %v3632_v60 }
0x18f2   :  { %3484 = vmatprep.subr.mxu0 %v3983_v0  ;;  %3489 = vmatprep.subr.mxu1 %v3983_v0 }
0x18f4   :  { %3471 = vmatmul.mubr.msk.f32.vlgmr.msra.gmra.mrb[28].mxu0 %vm742_vm2, %v2767_v12  ;;  %3482 = vmatmul.mubr.msk.f32.vlgmr.msra.gmra.mrb[28].mxu1 %vm742_vm2, %v2767_v12 }
0x18f5   :  { %3486 = vmatprep.mubr.msk.f32.mxu0 %vm3985_vm1, %v3983_v0  ;;  %3491 = vmatprep.mubr.msk.f32.mxu1 %vm3985_vm1, %v3983_v0 }
0x19be   :  { %v2664_v25 = vpop.f32.mrb[26].mxu0  ;;  %v2740_v14 = vpop.f32.mrb[26].mxu1 }
0x19bf   :  { %v2741_v15 = vadd.f32 %v2740_v14, %v2664_v25  ;;  %v3456_v13 = vpop.f32.mrb[27].mxu0  ;;  %v3461_v26 = vpop.f32.mrb[27].mxu1 }
0x19c1   :  { %v2750_v20 = vadd.f32 %v3139_v19, %v2741_v15 }
0x19c3   :  { %v2751_v16 = vsel %vm2444_vm8, %v2750_v20, -1e+30 }
0x19c4   :  { %v2753_v17 = vsel %vm2752_vm9, %v2751_v16, -inf }
0x19c5   :  { %2754 = vmax.xlane.f32.xlu0 %v2753_v17 }
0x19c7   :  { %v2836_v0 = vpop.f32.mrb[28].mxu0  ;;  %v2906_v37 = vpop.f32.mrb[28].mxu1 }
0x19c8   :  { %v3472_v27 = vpop.f32.mrb[29].mxu0  ;;  %v3483_v18 = vpop.f32.mrb[29].mxu1  ;;  %3485 = vmatpush3.msk.msra.mxu0 %vm2594_vm6, %v2906_v37  ;;  %3490 = vmatpush3.msk.msra.mxu1 %vm2594_vm6, %v2836_v0 }
0x19c9   :  { %3487 = vmatmul.mubr.msk.f32.vlgmr.msra.gmra.mrb[30].mxu0 %vm2590_vm7, %v3132_v7  ;;  %3492 = vmatmul.mubr.msk.f32.vlgmr.msra.gmra.mrb[30].mxu1 %vm2590_vm7, %v3131_v8 }
0x1a52   :  { %v2755_v44 = vpop.xlane.xlu0 %2754 }
0x1a53   :  { %v2756_v21 = vsub.f32 %v2751_v16, %v2755_v44 }
0x1a55   :  { %v2757_v22 = vmul.f32 1.442695, %v2756_v21 }
0x1a57   :  { %3799 = vpow2.f32 %v2757_v22 }
0x1a61   :  { %v3800_v23 = vpop.eup %3799 }
0x1a62   :  { %v2759_v42 = vsel %vm2752_vm9, %v3800_v23, 0.0 }
0x1a63   :  { %2760 = vadd.xlane.f32.xlu0 %v2759_v42 }
0x1a9c   :  { %v2979_v35 = vpop.f32.mrb[30].mxu0  ;;  %v3052_v24 = vpop.f32.mrb[30].mxu1 }
0x1a9d   :  { %v3053_v28 = vadd.f32 %v3052_v24, %v2979_v35  ;;  %v3488_v29 = vpop.f32.mrb[31].mxu0  ;;  %v3493_v30 = vpop.f32.mrb[31].mxu1 }
0x1a9f   :  { %v3056_v31 = vadd.f32 %v3139_v19, %v3053_v28 }
0x1aa1   :  { %v3057_v32 = vsel %vm2444_vm8, %v3056_v31, -1e+30 }
0x1aa2   :  { %v3058_v36 = vsel %vm2752_vm9, %v3057_v32, -inf }
0x1aa3   :  { %3059 = vmax.xlane.f32.xlu1 %v3058_v36 }
0x1af0   :  { %v2761_v47 = vpop.xlane.xlu0 %2760 }
0x1af1   :  { %3801 = vrcp.f32 %v2761_v47 }
0x1afb   :  { %v3802_v49 = vpop.eup %3801 }
0x1afc   :  { %v2763_v50 = vmul.f32 %v3802_v49, %v3800_v23 }
0x1afe   :  { %2764 = vst [vmem:[#allocation13] sm:$0x3] %v2763_v50 }
0x1b30   :  { %v3060_v51 = vpop.xlane.xlu1 %3059 }
0x1b31   :  { %v3061_v43 = vsub.f32 %v3057_v32, %v3060_v51 }
0x1b33   :  { %v3062_v52 = vmul.f32 1.442695, %v3061_v43 }
0x1b35   :  { %3803 = vpow2.f32 %v3062_v52 }
0x1b3f   :  { %v3804_v53 = vpop.eup %3803 }
0x1b40   :  { %v3064_v54 = vsel %vm2752_vm9, %v3804_v53, 0.0 }
0x1b41   :  { %3065 = vadd.xlane.f32.xlu0 %v3064_v54 }
0x1bce   :  { %v3066_v55 = vpop.xlane.xlu0 %3065 }
0x1bcf   :  { %3805 = vrcp.f32 %v3066_v55 }
0x1bd9   :  { %v3806_v41 = vpop.eup %3805 }
0x1bda   :  { %v3068_v33 = vmul.f32 %v3806_v41, %v3804_v53 }
0x1bdc   :  { %3069 = vst [vmem:[#allocation13 + $0x2] sm:$0x3] %v3068_v33 }
0x1bdd   :  { %3950 = shalt.err (!%p3947_p10)
}
0x1bde   :  { %s3951_s14 = scalar_lea.hbm %s4484_s8, 64 }
0x1bdf   :  { %p3952_p11 = scmp.ne.s32.totalorder %s4484_s8, %s3951_s14  ;;  %p3955_p12 = scmp.lt.u32.totalorder %s3951_s14, %s4484_s8 }
0x1be1   :  { %p3957_p13 = pnand %p3955_p12, %p3952_p11 }
0x1be3   :  { %3960 = shalt.err (!%p3957_p13)
}
0x1be4   :  { %3079 = dma.vmem_to_hbm [thread:$0]  %s3077_s23, 64, %s4484_s8, [#allocation4]  }
0x1be5   :  { %3969 = dma.done.wait [#allocation4], 64  }
0x1be6   :  { %3970 = vsyncadd [#allocation4], 4294967232 }
0x1be7   :  { %3083 = vsyncpa [#allocation3], 1 }
0x1be8   :  { %3084 = vsyncpa [#allocation6], 1 }
0x1be9   :  { %3085 = vsyncpa [#allocation9], 1 }
0x1bea   :  { %3086 = vsyncpa [#allocation12], 1 }
0x1beb   :  { %3087 = vsyncpa [#allocation4], 1 }

</bundles_post_ra>
